<compile_context>
chip_gen: v7x
topology: tpu7x:2x2x1
jax: 0.10.0
libtpu: 0.0.40
codegen_flags: <defaults>
</compile_context>

<pallas_src>
import jax
import jax.numpy as jnp
from jax.experimental import pallas as pl
from jax.experimental.pallas import tpu as pltpu

INPUT_DIM = 784
HIDDEN_DIM = 400
LATENT_DIM = 20

HID_P = 512             # 400 -> 4 * 128 (lane-aligned hidden width)
MULV_P = 128            # mu|logvar head padded to one full lane group


def _round_up(n, m):
    return (n + m - 1) // m * m


def vae_kernel(x_ref, eps_ref,
               w1_ref, b1_ref,
               wmulv_ref, bmulv_ref,
               w2_ref, b2_ref,
               w3_ref, b3_ref,
               recon_ref, mulv_ref):
    # ---- encode ----
    x = x_ref[...]                                                     # (TB, 784) bf16
    h1 = jnp.dot(x, w1_ref[...],
                 preferred_element_type=jnp.float32) + b1_ref[...]
    h1 = jnp.maximum(h1, 0.0)                                          # (TB, 512) f32

    # fused, lane-dense mu|logvar head: one (512, 128) matmul
    mulv = jnp.dot(h1.astype(jnp.bfloat16), wmulv_ref[...],
                   preferred_element_type=jnp.float32) + bmulv_ref[...]  # (TB, 128)
    mu = mulv[:, :LATENT_DIM]
    logvar = mulv[:, LATENT_DIM:2 * LATENT_DIM]

    # ---- reparameterize (f32 elementwise; eps supplied from outside) ----
    std = jnp.exp(0.5 * logvar)
    z = mu + eps_ref[...] * std                                        # (TB, 20) f32

    # ---- decode ----
    h2 = jnp.dot(z.astype(jnp.bfloat16), w2_ref[...],
                 preferred_element_type=jnp.float32) + b2_ref[...]
    h2 = jnp.maximum(h2, 0.0)                                          # (TB, 512) f32
    logits = jnp.dot(h2.astype(jnp.bfloat16), w3_ref[...],
                     preferred_element_type=jnp.float32) + b3_ref[...] # (TB, 784) f32

    recon_ref[...] = jax.nn.sigmoid(logits).astype(recon_ref.dtype)    # bf16 store
    mulv_ref[...] = mulv                                               # (TB, 128) f32


def init_params(key):
    """Deterministic init mirroring nn.Linear's U(-1/sqrt(fan_in), 1/sqrt(fan_in)).
    Weights stored as (in, out); biases as (1, out). Unpadded, f32."""
    def linear(k, fan_in, fan_out):
        kw, kb = jax.random.split(k)
        bound = 1.0 / jnp.sqrt(fan_in)
        w = jax.random.uniform(kw, (fan_in, fan_out), jnp.float32, -bound, bound)
        b = jax.random.uniform(kb, (1, fan_out), jnp.float32, -bound, bound)
        return w, b

    k1, k2, k3, k4, k5 = jax.random.split(key, 5)
    w1, b1 = linear(k1, INPUT_DIM, HIDDEN_DIM)
    wmu, bmu = linear(k2, HIDDEN_DIM, LATENT_DIM)
    wlv, blv = linear(k3, HIDDEN_DIM, LATENT_DIM)
    w2, b2 = linear(k4, LATENT_DIM, HIDDEN_DIM)
    w3, b3 = linear(k5, HIDDEN_DIM, INPUT_DIM)
    return (w1, b1, wmu, bmu, wlv, blv, w2, b2, w3, b3)


def pack_params(params):
    """Pad hidden/output dims to lane-aligned sizes, fuse the mu/logvar heads
    into one lane-dense 128-wide head, cast MXU weights to bf16.
    Zero padding is numerically exact (zero rows/cols/bias contribute 0).
    Input dims stay at their true sizes (784 / 20) -- no input-side padding."""
    (w1, b1, wmu, bmu, wlv, blv, w2, b2, w3, b3) = params

    # fc1: (784, 400) -> (784, 512)    (only the output dim is padded)
    w1p = jnp.zeros((INPUT_DIM, HID_P), jnp.float32).at[:, :HIDDEN_DIM].set(w1)
    b1p = jnp.zeros((1, HID_P), jnp.float32).at[:, :HIDDEN_DIM].set(b1)

    # fused mu|logvar head: (400, 20)+(400, 20) -> (512, 128)
    wmulv = jnp.zeros((HID_P, MULV_P), jnp.float32)
    wmulv = wmulv.at[:HIDDEN_DIM, :LATENT_DIM].set(wmu)
    wmulv = wmulv.at[:HIDDEN_DIM, LATENT_DIM:2 * LATENT_DIM].set(wlv)
    bmulv = jnp.zeros((1, MULV_P), jnp.float32)
    bmulv = bmulv.at[:, :LATENT_DIM].set(bmu)
    bmulv = bmulv.at[:, LATENT_DIM:2 * LATENT_DIM].set(blv)

    # fc2: (20, 400) -> (20, 512)
    w2p = jnp.zeros((LATENT_DIM, HID_P), jnp.float32).at[:, :HIDDEN_DIM].set(w2)
    b2p = jnp.zeros((1, HID_P), jnp.float32).at[:, :HIDDEN_DIM].set(b2)

    # fc3: (400, 784) -> (512, 784)    (only the contraction dim is padded)
    w3p = jnp.zeros((HID_P, INPUT_DIM), jnp.float32).at[:HIDDEN_DIM, :].set(w3)
    b3p = b3                                                           # (1, 784)

    return (w1p.astype(jnp.bfloat16), b1p,
            wmulv.astype(jnp.bfloat16), bmulv,
            w2p.astype(jnp.bfloat16), b2p,
            w3p.astype(jnp.bfloat16), b3p)


def _choose_tile(B, tb):
    """Batch tile: multiple of 8, <= tb, and >= 2 grid steps when B >= 16 so
    the ("parallel",) axis can be megacore-sharded on v7x."""
    TB = min(tb, _round_up(B, 8))
    if B >= 16 and _round_up(B, TB) // TB < 2:
        TB = _round_up(-(-B // 2), 8)
    return TB


def vae_forward(x, eps, packed, *, tb=512):
    """x: (B, ...) flattened to (B, 784). Returns (recon[bf16], mu, logvar)."""
    B = x.shape[0]
    x2 = x.reshape(B, INPUT_DIM).astype(jnp.bfloat16)     # cast only; no width pad
    eps = eps.astype(jnp.float32)

    TB = _choose_tile(B, tb)
    B_pad = _round_up(B, TB)
    if B_pad != B:                                         # batch-only pad, rare
        x2 = jnp.pad(x2, ((0, B_pad - B), (0, 0)))
        eps = jnp.pad(eps, ((0, B_pad - B), (0, 0)))

    (w1, b1, wmulv, bmulv, w2, b2, w3, b3) = packed

    grid = (B_pad // TB,)
    const = lambda i: (0, 0)    # weights/biases: same block every step -> VMEM resident
    batch = lambda i: (i, 0)    # activations: tiled over the batch

    weight_bytes = 2 * (INPUT_DIM * HID_P + HID_P * MULV_P
                        + LATENT_DIM * HID_P + HID_P * INPUT_DIM)
    act_bytes = B_pad * (INPUT_DIM * 2 + LATENT_DIM * 4      # x, eps in
                         + INPUT_DIM * 2 + MULV_P * 4)       # recon, mulv out
    cost = pl.CostEstimate(
        flops=2 * B_pad * (INPUT_DIM * HID_P + HID_P * MULV_P
                           + LATENT_DIM * HID_P + HID_P * INPUT_DIM),
        transcendentals=B_pad * (LATENT_DIM + INPUT_DIM),
        bytes_accessed=weight_bytes + act_bytes,
    )

    recon_p, mulv = pl.pallas_call(
        vae_kernel,
        grid=grid,
        out_shape=(
            jax.ShapeDtypeStruct((B_pad, INPUT_DIM), jnp.bfloat16),  # recon
            jax.ShapeDtypeStruct((B_pad, MULV_P), jnp.float32),      # mu | logvar
        ),
        in_specs=[
            pl.BlockSpec((TB, INPUT_DIM), batch),        # x      (last dim = full)
            pl.BlockSpec((TB, LATENT_DIM), batch),       # eps    (last dim = full)
            pl.BlockSpec((INPUT_DIM, HID_P), const),     # w1
            pl.BlockSpec((1, HID_P), const),             # b1
            pl.BlockSpec((HID_P, MULV_P), const),        # w_mu|lv
            pl.BlockSpec((1, MULV_P), const),            # b_mu|lv
            pl.BlockSpec((LATENT_DIM, HID_P), const),    # w2
            pl.BlockSpec((1, HID_P), const),             # b2
            pl.BlockSpec((HID_P, INPUT_DIM), const),     # w3
            pl.BlockSpec((1, INPUT_DIM), const),         # b3
        ],
        out_specs=(
            pl.BlockSpec((TB, INPUT_DIM), batch),
            pl.BlockSpec((TB, MULV_P), batch),
        ),
        compiler_params=pltpu.CompilerParams(
            dimension_semantics=("parallel",),
            vmem_limit_bytes=32 << 20,
        ),
        cost_estimate=cost,
    )(x2, eps, w1, b1, wmulv, bmulv, w2, b2, w3, b3)

    recon = recon_p if B_pad == B else recon_p[:B]
    mu = mulv[:B, :LATENT_DIM]
    logvar = mulv[:B, LATENT_DIM:2 * LATENT_DIM]
    return recon, mu, logvar


def vae_forward_ref(x, eps, packed):
    """Pure-JAX reference with identical (bf16-matmul, f32-accumulate) math."""
    (w1, b1, wmulv, bmulv, w2, b2, w3, b3) = packed
    B = x.shape[0]
    xb = x.reshape(B, INPUT_DIM).astype(jnp.bfloat16)

    h1 = jnp.maximum(
        jnp.dot(xb, w1, preferred_element_type=jnp.float32) + b1, 0.0)
    mulv = jnp.dot(h1.astype(jnp.bfloat16), wmulv,
                   preferred_element_type=jnp.float32) + bmulv
    mu = mulv[:, :LATENT_DIM]
    logvar = mulv[:, LATENT_DIM:2 * LATENT_DIM]
    z = mu + eps * jnp.exp(0.5 * logvar)
    h2 = jnp.maximum(
        jnp.dot(z.astype(jnp.bfloat16), w2, preferred_element_type=jnp.float32) + b2, 0.0)
    logits = jnp.dot(h2.astype(jnp.bfloat16), w3,
                     preferred_element_type=jnp.float32) + b3
    recon = jax.nn.sigmoid(logits)
    return recon, mu, logvar


if __name__ == "__main__":
    key = jax.random.PRNGKey(0)
    k_param, k_x, k_eps = jax.random.split(key, 3)

    params = init_params(k_param)
    packed = pack_params(params)

    # x shaped like an MNIST batch (NCHW); forward flattens to (-1, 784).
    B = 8
    x = jax.random.uniform(k_x, (B, 1, 28, 28), jnp.float32)
    eps = jax.random.normal(k_eps, (B, LATENT_DIM), jnp.float32)

    recon, mu, logvar = vae_forward(x, eps, packed)
    jax.block_until_ready((recon, mu, logvar))

    r_ref, mu_ref, lv_ref = vae_forward_ref(x, eps, packed)
    assert recon.shape == (B, INPUT_DIM)
    assert mu.shape == (B, LATENT_DIM) and logvar.shape == (B, LATENT_DIM)
    assert jnp.allclose(recon.astype(jnp.float32), r_ref, atol=1e-2, rtol=1e-2)
    assert jnp.allclose(mu, mu_ref, atol=1e-2, rtol=1e-2)
    assert jnp.allclose(logvar, lv_ref, atol=1e-2, rtol=1e-2)

    print("KERNEL_OK")
</pallas_src>

<mosaic_0001>
module attributes {stable_mosaic.version = 11 : i64} {
  func.func @vae_kernel(%arg0: i32, %arg1: memref<8x784xbf16, #tpu.memory_space<vmem>>, %arg2: memref<8x20xf32, #tpu.memory_space<vmem>>, %arg3: memref<784x512xbf16, #tpu.memory_space<vmem>>, %arg4: memref<1x512xf32, #tpu.memory_space<vmem>>, %arg5: memref<512x128xbf16, #tpu.memory_space<vmem>>, %arg6: memref<1x128xf32, #tpu.memory_space<vmem>>, %arg7: memref<20x512xbf16, #tpu.memory_space<vmem>>, %arg8: memref<1x512xf32, #tpu.memory_space<vmem>>, %arg9: memref<512x784xbf16, #tpu.memory_space<vmem>>, %arg10: memref<1x784xf32, #tpu.memory_space<vmem>>, %arg11: memref<8x784xbf16, #tpu.memory_space<vmem>>, %arg12: memref<8x128xf32, #tpu.memory_space<vmem>>) attributes {dimension_semantics = [#tpu.dimension_semantics<parallel>], iteration_bounds = array<i64: 1>, scalar_prefetch = 0 : i64, scratch_operands = 0 : i64, tpu.core_type = #tpu.core_type<tc>, window_params = [{transform_indices = @transform_0, window_bounds = array<i64: 8, 784>}, {transform_indices = @transform_1, window_bounds = array<i64: 8, 20>}, {pipeline_mode = #tpu.pipeline_mode<synchronous>, transform_indices = @transform_2, window_bounds = array<i64: 784, 512>}, {pipeline_mode = #tpu.pipeline_mode<synchronous>, transform_indices = @transform_3, window_bounds = array<i64: 1, 512>}, {pipeline_mode = #tpu.pipeline_mode<synchronous>, transform_indices = @transform_4, window_bounds = array<i64: 512, 128>}, {pipeline_mode = #tpu.pipeline_mode<synchronous>, transform_indices = @transform_5, window_bounds = array<i64: 1, 128>}, {pipeline_mode = #tpu.pipeline_mode<synchronous>, transform_indices = @transform_6, window_bounds = array<i64: 20, 512>}, {pipeline_mode = #tpu.pipeline_mode<synchronous>, transform_indices = @transform_7, window_bounds = array<i64: 1, 512>}, {pipeline_mode = #tpu.pipeline_mode<synchronous>, transform_indices = @transform_8, window_bounds = array<i64: 512, 784>}, {pipeline_mode = #tpu.pipeline_mode<synchronous>, transform_indices = @transform_9, window_bounds = array<i64: 1, 784>}, {transform_indices = @transform_10, window_bounds = array<i64: 8, 784>}, {transform_indices = @transform_11, window_bounds = array<i64: 8, 128>}]} {
    %c0 = arith.constant 0 : index
    %c0_0 = arith.constant 0 : index
    %0 = vector.load %arg1[%c0, %c0_0] : memref<8x784xbf16, #tpu.memory_space<vmem>>, vector<8x784xbf16>
    %c0_1 = arith.constant 0 : index
    %c0_2 = arith.constant 0 : index
    %1 = vector.load %arg3[%c0_1, %c0_2] : memref<784x512xbf16, #tpu.memory_space<vmem>>, vector<784x512xbf16>
    %cst = arith.constant dense<0.000000e+00> : vector<8x512xf32>
    %2 = tpu.matmul %0, %1, %cst {dimension_numbers = #tpu.dot_dimension_numbers<[1], [0], [0], [1], [0, 0, 1, 1], [], []>} : vector<8x784xbf16>, vector<784x512xbf16>, vector<8x512xf32> -> vector<8x512xf32>
    %c0_3 = arith.constant 0 : index
    %c0_4 = arith.constant 0 : index
    %3 = vector.load %arg4[%c0_3, %c0_4] : memref<1x512xf32, #tpu.memory_space<vmem>>, vector<1x512xf32>
    %4 = vector.broadcast %3 : vector<1x512xf32> to vector<8x512xf32>
    %5 = arith.addf %2, %4 : vector<8x512xf32>
    %cst_5 = arith.constant 0.000000e+00 : f32
    %6 = vector.broadcast %cst_5 : f32 to vector<8x512xf32>
    %7 = arith.maximumf %5, %6 : vector<8x512xf32>
    %8 = arith.truncf %7 : vector<8x512xf32> to vector<8x512xbf16>
    %c0_6 = arith.constant 0 : index
    %c0_7 = arith.constant 0 : index
    %9 = vector.load %arg5[%c0_6, %c0_7] : memref<512x128xbf16, #tpu.memory_space<vmem>>, vector<512x128xbf16>
    %cst_8 = arith.constant dense<0.000000e+00> : vector<8x128xf32>
    %10 = tpu.matmul %8, %9, %cst_8 {dimension_numbers = #tpu.dot_dimension_numbers<[1], [0], [0], [1], [0, 0, 1, 1], [], []>} : vector<8x512xbf16>, vector<512x128xbf16>, vector<8x128xf32> -> vector<8x128xf32>
    %c0_9 = arith.constant 0 : index
    %c0_10 = arith.constant 0 : index
    %11 = vector.load %arg6[%c0_9, %c0_10] : memref<1x128xf32, #tpu.memory_space<vmem>>, vector<1x128xf32>
    %12 = vector.broadcast %11 : vector<1x128xf32> to vector<8x128xf32>
    %13 = arith.addf %10, %12 : vector<8x128xf32>
    %14 = vector.extract_strided_slice %13 {offsets = [0, 0], sizes = [8, 20], strides = [1, 1]} : vector<8x128xf32> to vector<8x20xf32>
    %15 = vector.extract_strided_slice %13 {offsets = [0, 20], sizes = [8, 20], strides = [1, 1]} : vector<8x128xf32> to vector<8x20xf32>
    %cst_11 = arith.constant 5.000000e-01 : f32
    %16 = vector.broadcast %cst_11 : f32 to vector<8x20xf32>
    %17 = arith.mulf %16, %15 : vector<8x20xf32>
    %18 = math.exp %17 : vector<8x20xf32>
    %c0_12 = arith.constant 0 : index
    %c0_13 = arith.constant 0 : index
    %19 = vector.load %arg2[%c0_12, %c0_13] : memref<8x20xf32, #tpu.memory_space<vmem>>, vector<8x20xf32>
    %20 = arith.mulf %19, %18 : vector<8x20xf32>
    %21 = arith.addf %14, %20 : vector<8x20xf32>
    %22 = arith.truncf %21 : vector<8x20xf32> to vector<8x20xbf16>
    %c0_14 = arith.constant 0 : index
    %c0_15 = arith.constant 0 : index
    %23 = vector.load %arg7[%c0_14, %c0_15] : memref<20x512xbf16, #tpu.memory_space<vmem>>, vector<20x512xbf16>
    %cst_16 = arith.constant dense<0.000000e+00> : vector<8x512xf32>
    %24 = tpu.matmul %22, %23, %cst_16 {dimension_numbers = #tpu.dot_dimension_numbers<[1], [0], [0], [1], [0, 0, 1, 1], [], []>} : vector<8x20xbf16>, vector<20x512xbf16>, vector<8x512xf32> -> vector<8x512xf32>
    %c0_17 = arith.constant 0 : index
    %c0_18 = arith.constant 0 : index
    %25 = vector.load %arg8[%c0_17, %c0_18] : memref<1x512xf32, #tpu.memory_space<vmem>>, vector<1x512xf32>
    %26 = vector.broadcast %25 : vector<1x512xf32> to vector<8x512xf32>
    %27 = arith.addf %24, %26 : vector<8x512xf32>
    %cst_19 = arith.constant 0.000000e+00 : f32
    %28 = vector.broadcast %cst_19 : f32 to vector<8x512xf32>
    %29 = arith.maximumf %27, %28 : vector<8x512xf32>
    %30 = arith.truncf %29 : vector<8x512xf32> to vector<8x512xbf16>
    %c0_20 = arith.constant 0 : index
    %c0_21 = arith.constant 0 : index
    %31 = vector.load %arg9[%c0_20, %c0_21] : memref<512x784xbf16, #tpu.memory_space<vmem>>, vector<512x784xbf16>
    %cst_22 = arith.constant dense<0.000000e+00> : vector<8x784xf32>
    %32 = tpu.matmul %30, %31, %cst_22 {dimension_numbers = #tpu.dot_dimension_numbers<[1], [0], [0], [1], [0, 0, 1, 1], [], []>} : vector<8x512xbf16>, vector<512x784xbf16>, vector<8x784xf32> -> vector<8x784xf32>
    %c0_23 = arith.constant 0 : index
    %c0_24 = arith.constant 0 : index
    %33 = vector.load %arg10[%c0_23, %c0_24] : memref<1x784xf32, #tpu.memory_space<vmem>>, vector<1x784xf32>
    %34 = vector.broadcast %33 : vector<1x784xf32> to vector<8x784xf32>
    %35 = arith.addf %32, %34 : vector<8x784xf32>
    %36 = arith.negf %35 : vector<8x784xf32>
    %37 = math.exp %36 : vector<8x784xf32>
    %cst_25 = arith.constant 1.000000e+00 : f32
    %38 = vector.broadcast %cst_25 : f32 to vector<8x784xf32>
    %39 = arith.addf %38, %37 : vector<8x784xf32>
    %40 = arith.divf %38, %39 : vector<8x784xf32>
    %41 = arith.truncf %40 : vector<8x784xf32> to vector<8x784xbf16>
    %c0_26 = arith.constant 0 : index
    %c0_27 = arith.constant 0 : index
    %42 = vector.load %arg11[%c0_26, %c0_27] : memref<8x784xbf16, #tpu.memory_space<vmem>>, vector<8x784xbf16>
    tpu.vector_store %arg11[%c0_26, %c0_27], %41 {strides = array<i32>} : memref<8x784xbf16, #tpu.memory_space<vmem>>, vector<8x784xbf16>,
    %c0_28 = arith.constant 0 : index
    %c0_29 = arith.constant 0 : index
    %43 = vector.load %arg12[%c0_28, %c0_29] : memref<8x128xf32, #tpu.memory_space<vmem>>, vector<8x128xf32>
    tpu.vector_store %arg12[%c0_28, %c0_29], %13 {strides = array<i32>} : memref<8x128xf32, #tpu.memory_space<vmem>>, vector<8x128xf32>,
    return
  }
  func.func @transform_0(%arg0: i32) -> (i32, i32) {
    %c0_i32 = arith.constant 0 : i32
    %c0_i32_0 = arith.constant 0 : i32
    return %arg0, %c0_i32 : i32, i32
  }
  func.func @transform_1(%arg0: i32) -> (i32, i32) {
    %c0_i32 = arith.constant 0 : i32
    %c0_i32_0 = arith.constant 0 : i32
    return %arg0, %c0_i32 : i32, i32
  }
  func.func @transform_2(%arg0: i32) -> (i32, i32) {
    %c0_i32 = arith.constant 0 : i32
    %c0_i32_0 = arith.constant 0 : i32
    %c0_i32_1 = arith.constant 0 : i32
    return %c0_i32, %c0_i32_0 : i32, i32
  }
  func.func @transform_3(%arg0: i32) -> (i32, i32) {
    %c0_i32 = arith.constant 0 : i32
    %c0_i32_0 = arith.constant 0 : i32
    %c0_i32_1 = arith.constant 0 : i32
    return %c0_i32, %c0_i32_0 : i32, i32
  }
  func.func @transform_4(%arg0: i32) -> (i32, i32) {
    %c0_i32 = arith.constant 0 : i32
    %c0_i32_0 = arith.constant 0 : i32
    %c0_i32_1 = arith.constant 0 : i32
    return %c0_i32, %c0_i32_0 : i32, i32
  }
  func.func @transform_5(%arg0: i32) -> (i32, i32) {
    %c0_i32 = arith.constant 0 : i32
    %c0_i32_0 = arith.constant 0 : i32
    %c0_i32_1 = arith.constant 0 : i32
    return %c0_i32, %c0_i32_0 : i32, i32
  }
  func.func @transform_6(%arg0: i32) -> (i32, i32) {
    %c0_i32 = arith.constant 0 : i32
    %c0_i32_0 = arith.constant 0 : i32
    %c0_i32_1 = arith.constant 0 : i32
    return %c0_i32, %c0_i32_0 : i32, i32
  }
  func.func @transform_7(%arg0: i32) -> (i32, i32) {
    %c0_i32 = arith.constant 0 : i32
    %c0_i32_0 = arith.constant 0 : i32
    %c0_i32_1 = arith.constant 0 : i32
    return %c0_i32, %c0_i32_0 : i32, i32
  }
  func.func @transform_8(%arg0: i32) -> (i32, i32) {
    %c0_i32 = arith.constant 0 : i32
    %c0_i32_0 = arith.constant 0 : i32
    %c0_i32_1 = arith.constant 0 : i32
    return %c0_i32, %c0_i32_0 : i32, i32
  }
  func.func @transform_9(%arg0: i32) -> (i32, i32) {
    %c0_i32 = arith.constant 0 : i32
    %c0_i32_0 = arith.constant 0 : i32
    %c0_i32_1 = arith.constant 0 : i32
    return %c0_i32, %c0_i32_0 : i32, i32
  }
  func.func @transform_10(%arg0: i32) -> (i32, i32) {
    %c0_i32 = arith.constant 0 : i32
    %c0_i32_0 = arith.constant 0 : i32
    return %arg0, %c0_i32 : i32, i32
  }
  func.func @transform_11(%arg0: i32) -> (i32, i32) {
    %c0_i32 = arith.constant 0 : i32
    %c0_i32_0 = arith.constant 0 : i32
    return %arg0, %c0_i32 : i32, i32
  }
}

</mosaic_0001>

<bundles_post_ra>
// kernel: tpu_custom_call.1
= control target key start
LH: loop header
LB: loop body
LE: loop exit
PB: predicated region body
PF: predicated region fallthrough
CT: control target
= control target key end

     0   :  { %17 = vsyncpa [#allocation3], 0  ;;  %vm1266_vm0 = vcmask 130048   ;;  %s6945_s0 = inlined_call_operand.vmem [shape: bf16[8,784], index: 0, kind: input, shape index: {}]   ;;  %s6946_s1 = inlined_call_operand.vmem [shape: f32[8,20], index: 1, kind: input, shape index: {}]   ;;  %s6947_s2 = inlined_call_operand.vmem [shape: bf16[784,512], index: 2, kind: input, shape index: {}]   ;;  %s6948_s3 = inlined_call_operand.vmem [shape: f32[1,512], index: 3, kind: input, shape index: {}]   ;;  %s6949_s4 = inlined_call_operand.vmem [shape: bf16[512,128], index: 4, kind: input, shape index: {}]   ;;  %s6950_s5 = inlined_call_operand.vmem [shape: f32[1,128], index: 5, kind: input, shape index: {}]   ;;  %s6951_s6 = inlined_call_operand.vmem [shape: bf16[20,512], index: 6, kind: input, shape index: {}]   ;;  %s6952_s7 = inlined_call_operand.vmem [shape: f32[1,512], index: 7, kind: input, shape index: {}]   ;;  %s6953_s8 = inlined_call_operand.vmem [shape: bf16[512,784], index: 8, kind: input, shape index: {}]   ;;  %s6954_s9 = inlined_call_operand.vmem [shape: f32[1,784], index: 9, kind: input, shape index: {}]   ;;  %s6955_s10 = inlined_call_operand.hbm [shape: bf16[8,784], index: 10, kind: output, shape index: {0}]   ;;  %s6956_s11 = inlined_call_operand.hbm [shape: f32[8,128], index: 11, kind: output, shape index: {1}]  }
   0x1   :  { %v4628_v0 = vld [vmem:[%s6947_s2 + $0x4] ss:$16 sps:$4 sm:$0xff]   ;;  %v4630_v1 = vld [vmem:[%s6947_s2 + $0xc] ss:$16 sps:$4 sm:$0xff]   ;;  %v4632_v2 = vld [vmem:[%s6947_s2] ss:$16 sps:$4 sm:$0xff]  }
   0x2   :  { %1270 = vmatprep.subr.bf16.mxu0 %v4628_v0  ;;  %v4633_v3 = vld [vmem:[%s6947_s2 + $0x8] ss:$16 sps:$4 sm:$0xff]   ;;  %1434 = vmatprep.subr.bf16.mxu1 %v4630_v1  ;;  %v4634_v4 = vld [vmem:[%s6947_s2 + $0x24] ss:$16 sps:$4 sm:$0xff]   ;;  %v4636_v5 = vld [vmem:[%s6947_s2 + $0x2c] ss:$16 sps:$4 sm:$0xff]  }
   0x3   :  { %1271 = vmatpush1.bf16.msra.mxu0 %v4632_v2  ;;  %1435 = vmatpush1.bf16.msra.mxu1 %v4633_v3  ;;  %v4638_v6 = vld [vmem:[%s6947_s2 + $0x20] ss:$16 sps:$4 sm:$0xff]   ;;  %v4639_v7 = vld [vmem:[%s6947_s2 + $0x28] ss:$16 sps:$4 sm:$0xff]   ;;  %v4640_v8 = vld [vmem:[%s6947_s2 + $0x44] ss:$16 sps:$4 sm:$0xff]  }
   0x4   :  { %1272 = vmatprep.subr.bf16.mxu0 %v4634_v4  ;;  %1436 = vmatprep.subr.bf16.mxu1 %v4636_v5  ;;  %v4642_v9 = vld [vmem:[%s6947_s2 + $0x4c] ss:$16 sps:$4 sm:$0xff]   ;;  %v4644_v10 = vld [vmem:[%s6947_s2 + $0x40] ss:$16 sps:$4 sm:$0xff]   ;;  %v4645_v11 = vld [vmem:[%s6947_s2 + $0x48] ss:$16 sps:$4 sm:$0xff]  }
   0x5   :  { %v4646_v12 = vld [vmem:[%s6947_s2 + $0x64] ss:$16 sps:$4 sm:$0xff]   ;;  %v4648_v13 = vld [vmem:[%s6947_s2 + $0x6c] ss:$16 sps:$4 sm:$0xff]   ;;  %v4650_v14 = vld [vmem:[%s6947_s2 + $0x60] ss:$16 sps:$4 sm:$0xff]  }
   0x6   :  { %v4651_v15 = vld [vmem:[%s6947_s2 + $0x68] ss:$16 sps:$4 sm:$0xff]   ;;  %v4652_v16 = vld [vmem:[%s6947_s2 + $0x84] ss:$16 sps:$4 sm:$0xff]   ;;  %v4654_v17 = vld [vmem:[%s6947_s2 + $0x8c] ss:$16 sps:$4 sm:$0xff]  }
   0x7   :  { %1273 = vmatpush1.bf16.msra.mxu0 %v4638_v6  ;;  %1437 = vmatpush1.bf16.msra.mxu1 %v4639_v7  ;;  %v4656_v18 = vld [vmem:[%s6947_s2 + $0x80] ss:$16 sps:$4 sm:$0xff]   ;;  %v4657_v19 = vld [vmem:[%s6947_s2 + $0x88] ss:$16 sps:$4 sm:$0xff]   ;;  %v4658_v20 = vld [vmem:[%s6947_s2 + $0xa4] ss:$16 sps:$4 sm:$0xff]  }
   0x8   :  { %1274 = vmatprep.subr.bf16.mxu0 %v4640_v8  ;;  %1438 = vmatprep.subr.bf16.mxu1 %v4642_v9  ;;  %v4660_v21 = vld [vmem:[%s6947_s2 + $0xac] ss:$16 sps:$4 sm:$0xff]   ;;  %v4662_v22 = vld [vmem:[%s6947_s2 + $0xa0] ss:$16 sps:$4 sm:$0xff]   ;;  %v4663_v23 = vld [vmem:[%s6947_s2 + $0xa8] ss:$16 sps:$4 sm:$0xff]  }
   0x9   :  { %v4664_v24 = vld [vmem:[%s6947_s2 + $0xc4] ss:$16 sps:$4 sm:$0xff]   ;;  %v4666_v25 = vld [vmem:[%s6947_s2 + $0xcc] ss:$16 sps:$4 sm:$0xff]   ;;  %v4668_v26 = vld [vmem:[%s6947_s2 + $0xc0] ss:$16 sps:$4 sm:$0xff]  }
   0xa   :  { %v4669_v27 = vld [vmem:[%s6947_s2 + $0xc8] ss:$16 sps:$4 sm:$0xff]   ;;  %v4670_v28 = vld [vmem:[%s6947_s2 + $0xe4] ss:$16 sps:$4 sm:$0xff]   ;;  %v4672_v29 = vld [vmem:[%s6947_s2 + $0xec] ss:$16 sps:$4 sm:$0xff]  }
   0xb   :  { %1275 = vmatpush1.bf16.msra.mxu0 %v4644_v10  ;;  %1439 = vmatpush1.bf16.msra.mxu1 %v4645_v11  ;;  %v4674_v30 = vld [vmem:[%s6947_s2 + $0xe0] ss:$16 sps:$4 sm:$0xff]   ;;  %v4675_v31 = vld [vmem:[%s6947_s2 + $0xe8] ss:$16 sps:$4 sm:$0xff]   ;;  %v4676_v32 = vld [vmem:[%s6947_s2 + $0x104] ss:$16 sps:$4 sm:$0xff]  }
   0xc   :  { %1276 = vmatprep.subr.bf16.mxu0 %v4646_v12  ;;  %1440 = vmatprep.subr.bf16.mxu1 %v4648_v13  ;;  %v4678_v33 = vld [vmem:[%s6947_s2 + $0x10c] ss:$16 sps:$4 sm:$0xff]   ;;  %v4680_v34 = vld [vmem:[%s6947_s2 + $0x100] ss:$16 sps:$4 sm:$0xff]   ;;  %v4681_v35 = vld [vmem:[%s6947_s2 + $0x108] ss:$16 sps:$4 sm:$0xff]  }
   0xd   :  { %v4682_v36 = vld [vmem:[%s6947_s2 + $0x124] ss:$16 sps:$4 sm:$0xff]   ;;  %v4684_v37 = vld [vmem:[%s6947_s2 + $0x12c] ss:$16 sps:$4 sm:$0xff]   ;;  %v4686_v38 = vld [vmem:[%s6947_s2 + $0x120] ss:$16 sps:$4 sm:$0xff]  }
   0xe   :  { %v4687_v39 = vld [vmem:[%s6947_s2 + $0x128] ss:$16 sps:$4 sm:$0xff]   ;;  %v4688_v40 = vld [vmem:[%s6947_s2 + $0x144] ss:$16 sps:$4 sm:$0xff]   ;;  %v4690_v41 = vld [vmem:[%s6947_s2 + $0x14c] ss:$16 sps:$4 sm:$0xff]  }
   0xf   :  { %1277 = vmatpush1.bf16.msra.mxu0 %v4650_v14  ;;  %1441 = vmatpush1.bf16.msra.mxu1 %v4651_v15  ;;  %v4692_v42 = vld [vmem:[%s6947_s2 + $0x140] ss:$16 sps:$4 sm:$0xff]   ;;  %v4693_v43 = vld [vmem:[%s6947_s2 + $0x148] ss:$16 sps:$4 sm:$0xff]   ;;  %v4694_v44 = vld [vmem:[%s6947_s2 + $0x164] ss:$16 sps:$4 sm:$0xff]  }
  0x10   :  { %1278 = vmatprep.subr.bf16.mxu0 %v4652_v16  ;;  %1442 = vmatprep.subr.bf16.mxu1 %v4654_v17  ;;  %v4696_v45 = vld [vmem:[%s6947_s2 + $0x16c] ss:$16 sps:$4 sm:$0xff]   ;;  %v40_v46 = vld [vmem:[%s6945_s0] sm:$0xff]  ;;  %v4699_v49 = vld [vmem:[%s6947_s2 + $0x168] ss:$16 sps:$4 sm:$0xff]  }
  0x11   :  { %v4698_v47 = vld [vmem:[%s6947_s2 + $0x160] ss:$16 sps:$4 sm:$0xff]   ;;  %v4002_v48 = vcombine.high %v40_v46, %v40_v46  ;;  %v4700_v50 = vld [vmem:[%s6947_s2 + $0x184] ss:$16 sps:$4 sm:$0xff]   ;;  %v4702_v51 = vld [vmem:[%s6947_s2 + $0x18c] ss:$16 sps:$4 sm:$0xff]   ;;  %v4001_v4 = vcombine.low %v40_v46, %v40_v46 }
  0x12   :  { %v4704_v52 = vld [vmem:[%s6947_s2 + $0x180] ss:$16 sps:$4 sm:$0xff]   ;;  %v4705_v53 = vld [vmem:[%s6947_s2 + $0x188] ss:$16 sps:$4 sm:$0xff]   ;;  %v4706_v54 = vld [vmem:[%s6947_s2 + $0x1a4] ss:$16 sps:$4 sm:$0xff]  }
  0x13   :  { %1279 = vmatpush1.bf16.msra.mxu0 %v4656_v18  ;;  %1443 = vmatpush1.bf16.msra.mxu1 %v4657_v19  ;;  %v4708_v55 = vld [vmem:[%s6947_s2 + $0x1ac] ss:$16 sps:$4 sm:$0xff]   ;;  %v4710_v56 = vld [vmem:[%s6947_s2 + $0x1a0] ss:$16 sps:$4 sm:$0xff]   ;;  %v4711_v57 = vld [vmem:[%s6947_s2 + $0x1a8] ss:$16 sps:$4 sm:$0xff]  }
  0x14   :  { %1280 = vmatprep.subr.bf16.mxu0 %v4658_v20  ;;  %1444 = vmatprep.subr.bf16.mxu1 %v4660_v21  ;;  %v4712_v58 = vld [vmem:[%s6947_s2 + $0x1c4] ss:$16 sps:$4 sm:$0xff]   ;;  %v4714_v59 = vld [vmem:[%s6947_s2 + $0x1cc] ss:$16 sps:$4 sm:$0xff]   ;;  %v4716_v60 = vld [vmem:[%s6947_s2 + $0x1c0] ss:$16 sps:$4 sm:$0xff]  }
  0x15   :  { %1302 = vmatprep.mubr.bf16.mxu0 %v4002_v48  ;;  %1466 = vmatprep.mubr.bf16.mxu1 %v4002_v48  ;;  %v4717_v61 = vld [vmem:[%s6947_s2 + $0x1c8] ss:$16 sps:$4 sm:$0xff]   ;;  %v4718_v62 = vld [vmem:[%s6947_s2 + $0x1e4] ss:$16 sps:$4 sm:$0xff]   ;;  %v4720_v63 = vld [vmem:[%s6947_s2 + $0x1ec] ss:$16 sps:$4 sm:$0xff]  }
  0x16   :  { %v4722_v0 = vld [vmem:[%s6947_s2 + $0x1e0] ss:$16 sps:$4 sm:$0xff]   ;;  %v4723_v1 = vld [vmem:[%s6947_s2 + $0x1e8] ss:$16 sps:$4 sm:$0xff]   ;;  %v4728_v2 = vld [vmem:[%s6947_s2 + $0x204] ss:$16 sps:$4 sm:$0xff]  }
  0x17   :  { %1281 = vmatpush1.bf16.msra.mxu0 %v4662_v22  ;;  %1445 = vmatpush1.bf16.msra.mxu1 %v4663_v23  ;;  %v4731_v3 = vld [vmem:[%s6947_s2 + $0x20c] ss:$16 sps:$4 sm:$0xff]   ;;  %v4726_v5 = vld [vmem:[%s6947_s2 + $0x200] ss:$16 sps:$4 sm:$0xff]   ;;  %v4729_v6 = vld [vmem:[%s6947_s2 + $0x208] ss:$16 sps:$4 sm:$0xff]  }
  0x18   :  { %1282 = vmatprep.subr.bf16.mxu0 %v4664_v24  ;;  %1446 = vmatprep.subr.bf16.mxu1 %v4666_v25  ;;  %v4734_v7 = vld [vmem:[%s6947_s2 + $0x224] ss:$16 sps:$4 sm:$0xff]   ;;  %v4737_v8 = vld [vmem:[%s6947_s2 + $0x22c] ss:$16 sps:$4 sm:$0xff]   ;;  %v4732_v9 = vld [vmem:[%s6947_s2 + $0x220] ss:$16 sps:$4 sm:$0xff]  }
  0x19   :  { %v4735_v10 = vld [vmem:[%s6947_s2 + $0x228] ss:$16 sps:$4 sm:$0xff]   ;;  %v4740_v11 = vld [vmem:[%s6947_s2 + $0x244] ss:$16 sps:$4 sm:$0xff]   ;;  %v4743_v12 = vld [vmem:[%s6947_s2 + $0x24c] ss:$16 sps:$4 sm:$0xff]  }
  0x1a   :  { %v4738_v13 = vld [vmem:[%s6947_s2 + $0x240] ss:$16 sps:$4 sm:$0xff]   ;;  %v4741_v14 = vld [vmem:[%s6947_s2 + $0x248] ss:$16 sps:$4 sm:$0xff]   ;;  %v4746_v15 = vld [vmem:[%s6947_s2 + $0x264] ss:$16 sps:$4 sm:$0xff]  }
  0x1b   :  { %1283 = vmatpush1.bf16.msra.mxu0 %v4668_v26  ;;  %1447 = vmatpush1.bf16.msra.mxu1 %v4669_v27  ;;  %v4749_v16 = vld [vmem:[%s6947_s2 + $0x26c] ss:$16 sps:$4 sm:$0xff]   ;;  %v4744_v17 = vld [vmem:[%s6947_s2 + $0x260] ss:$16 sps:$4 sm:$0xff]   ;;  %v4747_v18 = vld [vmem:[%s6947_s2 + $0x268] ss:$16 sps:$4 sm:$0xff]  }
  0x1c   :  { %1284 = vmatprep.subr.bf16.mxu0 %v4670_v28  ;;  %1448 = vmatprep.subr.bf16.mxu1 %v4672_v29  ;;  %v4752_v19 = vld [vmem:[%s6947_s2 + $0x284] ss:$16 sps:$4 sm:$0xff]   ;;  %v4755_v20 = vld [vmem:[%s6947_s2 + $0x28c] ss:$16 sps:$4 sm:$0xff]   ;;  %v4750_v21 = vld [vmem:[%s6947_s2 + $0x280] ss:$16 sps:$4 sm:$0xff]  }
  0x1d   :  { %v4753_v22 = vld [vmem:[%s6947_s2 + $0x288] ss:$16 sps:$4 sm:$0xff]   ;;  %v4758_v23 = vld [vmem:[%s6947_s2 + $0x2a4] ss:$16 sps:$4 sm:$0xff]   ;;  %v4761_v24 = vld [vmem:[%s6947_s2 + $0x2ac] ss:$16 sps:$4 sm:$0xff]  }
  0x1e   :  { %v4756_v25 = vld [vmem:[%s6947_s2 + $0x2a0] ss:$16 sps:$4 sm:$0xff]   ;;  %v4759_v26 = vld [vmem:[%s6947_s2 + $0x2a8] ss:$16 sps:$4 sm:$0xff]   ;;  %v4764_v27 = vld [vmem:[%s6947_s2 + $0x2c4] ss:$16 sps:$4 sm:$0xff]  }
  0x1f   :  { %1285 = vmatpush1.bf16.msra.mxu0 %v4674_v30  ;;  %1449 = vmatpush1.bf16.msra.mxu1 %v4675_v31  ;;  %v4767_v28 = vld [vmem:[%s6947_s2 + $0x2cc] ss:$16 sps:$4 sm:$0xff]   ;;  %v4762_v31 = vld [vmem:[%s6947_s2 + $0x2c0] ss:$16 sps:$4 sm:$0xff]   ;;  %v4789_v48 = vld [vmem:[%s6947_s2 + $0x348] ss:$16 sps:$4 sm:$0xff]  }
  0x20   :  { %1286 = vmatprep.subr.bf16.mxu0 %v4676_v32  ;;  %1450 = vmatprep.subr.bf16.mxu1 %v4678_v33  ;;  %v5709_v29 = vld [vmem:[%s6945_s0 + $0x8] sm:$0xff]  ;;  %v4770_v33 = vld [vmem:[%s6947_s2 + $0x2e4] ss:$16 sps:$4 sm:$0xff]  }
  0x21   :  { %v4004_v30 = vcombine.high %v5709_v29, %v5709_v29  ;;  %v4765_v32 = vld [vmem:[%s6947_s2 + $0x2c8] ss:$16 sps:$4 sm:$0xff]   ;;  %v4791_v46 = vld [vmem:[%s6947_s2 + $0x34c] ss:$16 sps:$4 sm:$0xff]  }
  0x23   :  { %1287 = vmatpush1.bf16.msra.mxu0 %v4680_v34  ;;  %1451 = vmatpush1.bf16.msra.mxu1 %v4681_v35  ;;  %v4773_v34 = vld [vmem:[%s6947_s2 + $0x2ec] ss:$16 sps:$4 sm:$0xff]   ;;  %v4768_v35 = vld [vmem:[%s6947_s2 + $0x2e0] ss:$16 sps:$4 sm:$0xff]  }
  0x24   :  { %1288 = vmatprep.subr.bf16.mxu0 %v4682_v36  ;;  %1452 = vmatprep.subr.bf16.mxu1 %v4684_v37  ;;  %v4771_v36 = vld [vmem:[%s6947_s2 + $0x2e8] ss:$16 sps:$4 sm:$0xff]   ;;  %v4776_v37 = vld [vmem:[%s6947_s2 + $0x304] ss:$16 sps:$4 sm:$0xff]  }
  0x27   :  { %1289 = vmatpush1.bf16.msra.mxu0 %v4686_v38  ;;  %1453 = vmatpush1.bf16.msra.mxu1 %v4687_v39  ;;  %v4779_v38 = vld [vmem:[%s6947_s2 + $0x30c] ss:$16 sps:$4 sm:$0xff]   ;;  %v4774_v39 = vld [vmem:[%s6947_s2 + $0x300] ss:$16 sps:$4 sm:$0xff]  }
  0x28   :  { %1290 = vmatprep.subr.bf16.mxu0 %v4688_v40  ;;  %1454 = vmatprep.subr.bf16.mxu1 %v4690_v41  ;;  %v4777_v40 = vld [vmem:[%s6947_s2 + $0x308] ss:$16 sps:$4 sm:$0xff]   ;;  %v4782_v41 = vld [vmem:[%s6947_s2 + $0x324] ss:$16 sps:$4 sm:$0xff]  }
  0x2b   :  { %1291 = vmatpush1.bf16.msra.mxu0 %v4692_v42  ;;  %1455 = vmatpush1.bf16.msra.mxu1 %v4693_v43  ;;  %v4785_v42 = vld [vmem:[%s6947_s2 + $0x32c] ss:$16 sps:$4 sm:$0xff]   ;;  %v4780_v43 = vld [vmem:[%s6947_s2 + $0x320] ss:$16 sps:$4 sm:$0xff]  }
  0x2c   :  { %1292 = vmatprep.subr.bf16.mxu0 %v4694_v44  ;;  %1456 = vmatprep.subr.bf16.mxu1 %v4696_v45  ;;  %v4783_v44 = vld [vmem:[%s6947_s2 + $0x328] ss:$16 sps:$4 sm:$0xff]   ;;  %v4788_v45 = vld [vmem:[%s6947_s2 + $0x344] ss:$16 sps:$4 sm:$0xff]  }
  0x2f   :  { %1293 = vmatpush1.bf16.msra.mxu0 %v4698_v47  ;;  %1457 = vmatpush1.bf16.msra.mxu1 %v4699_v49  ;;  %v4786_v47 = vld [vmem:[%s6947_s2 + $0x340] ss:$16 sps:$4 sm:$0xff]   ;;  %v4794_v49 = vld [vmem:[%s6947_s2 + $0x364] ss:$16 sps:$4 sm:$0xff]  }
  0x30   :  { %1294 = vmatprep.subr.bf16.mxu0 %v4700_v50  ;;  %1458 = vmatprep.subr.bf16.mxu1 %v4702_v51  ;;  %v4797_v50 = vld [vmem:[%s6947_s2 + $0x36c] ss:$16 sps:$4 sm:$0xff]   ;;  %v4792_v51 = vld [vmem:[%s6947_s2 + $0x360] ss:$16 sps:$4 sm:$0xff]  }
  0x33   :  { %1295 = vmatpush1.bf16.msra.mxu0 %v4704_v52  ;;  %1459 = vmatpush1.bf16.msra.mxu1 %v4705_v53  ;;  %v4795_v52 = vld [vmem:[%s6947_s2 + $0x368] ss:$16 sps:$4 sm:$0xff]   ;;  %v4800_v53 = vld [vmem:[%s6947_s2 + $0x384] ss:$16 sps:$4 sm:$0xff]  }
  0x34   :  { %1296 = vmatprep.subr.bf16.mxu0 %v4706_v54  ;;  %1460 = vmatprep.subr.bf16.mxu1 %v4708_v55  ;;  %v4803_v54 = vld [vmem:[%s6947_s2 + $0x38c] ss:$16 sps:$4 sm:$0xff]   ;;  %v4798_v55 = vld [vmem:[%s6947_s2 + $0x380] ss:$16 sps:$4 sm:$0xff]  }
  0x37   :  { %1297 = vmatpush1.bf16.msra.mxu0 %v4710_v56  ;;  %1461 = vmatpush1.bf16.msra.mxu1 %v4711_v57  ;;  %v4801_v56 = vld [vmem:[%s6947_s2 + $0x388] ss:$16 sps:$4 sm:$0xff]   ;;  %v4806_v57 = vld [vmem:[%s6947_s2 + $0x3a4] ss:$16 sps:$4 sm:$0xff]  }
  0x38   :  { %1298 = vmatprep.subr.bf16.mxu0 %v4712_v58  ;;  %1462 = vmatprep.subr.bf16.mxu1 %v4714_v59  ;;  %v4809_v58 = vld [vmem:[%s6947_s2 + $0x3ac] ss:$16 sps:$4 sm:$0xff]   ;;  %v4804_v59 = vld [vmem:[%s6947_s2 + $0x3a0] ss:$16 sps:$4 sm:$0xff]  }
  0x3b   :  { %1299 = vmatpush1.bf16.msra.mxu0 %v4716_v60  ;;  %1463 = vmatpush1.bf16.msra.mxu1 %v4717_v61  ;;  %v4807_v60 = vld [vmem:[%s6947_s2 + $0x3a8] ss:$16 sps:$4 sm:$0xff]   ;;  %v4812_v61 = vld [vmem:[%s6947_s2 + $0x3c4] ss:$16 sps:$4 sm:$0xff]  }
  0x3c   :  { %1300 = vmatprep.subr.bf16.mxu0 %v4718_v62  ;;  %1464 = vmatprep.subr.bf16.mxu1 %v4720_v63  ;;  %v4815_v62 = vld [vmem:[%s6947_s2 + $0x3cc] ss:$16 sps:$4 sm:$0xff]   ;;  %v4810_v63 = vld [vmem:[%s6947_s2 + $0x3c0] ss:$16 sps:$4 sm:$0xff]  }
  0x3f   :  { %1301 = vmatpush1.bf16.msra.mxu0 %v4722_v0  ;;  %1465 = vmatpush1.bf16.msra.mxu1 %v4723_v1  ;;  %v4813_v0 = vld [vmem:[%s6947_s2 + $0x3c8] ss:$16 sps:$4 sm:$0xff]   ;;  %v4818_v1 = vld [vmem:[%s6947_s2 + $0x3e4] ss:$16 sps:$4 sm:$0xff]  }
  0x40   :  { %1311 = vmatprep.subr.bf16.mxu0 %v4728_v2  ;;  %1475 = vmatprep.subr.bf16.mxu1 %v4731_v3  ;;  %v4821_v2 = vld [vmem:[%s6947_s2 + $0x3ec] ss:$16 sps:$4 sm:$0xff]   ;;  %v4816_v3 = vld [vmem:[%s6947_s2 + $0x3e0] ss:$16 sps:$4 sm:$0xff]  }
  0x42   :  { %1303 = vmatmul.mubr.bf16.vlgmr.msra.gmra.mrb[0].mxu0 %v4001_v4  ;;  %1467 = vmatmul.mubr.bf16.vlgmr.msra.gmra.mrb[0].mxu1 %v4001_v4  ;;  %v4819_v4 = vld [vmem:[%s6947_s2 + $0x3e8] ss:$16 sps:$4 sm:$0xff]  }
  0x43   :  { %1312 = vmatpush1.bf16.msra.mxu0 %v4726_v5  ;;  %1476 = vmatpush1.bf16.msra.mxu1 %v4729_v6  ;;  %v4826_v5 = vld [vmem:[%s6947_s2 + $0x404] ss:$16 sps:$4 sm:$0xff]   ;;  %v4829_v6 = vld [vmem:[%s6947_s2 + $0x40c] ss:$16 sps:$4 sm:$0xff]  }
  0x44   :  { %1313 = vmatprep.subr.bf16.mxu0 %v4734_v7  ;;  %1477 = vmatprep.subr.bf16.mxu1 %v4737_v8  ;;  %v4003_v7 = vcombine.low %v5709_v29, %v5709_v29  ;;  %v4824_v8 = vld [vmem:[%s6947_s2 + $0x400] ss:$16 sps:$4 sm:$0xff]   ;;  %v4859_v29 = vld [vmem:[%s6947_s2 + $0x4ac] ss:$16 sps:$4 sm:$0xff]  }
  0x45   :  { %1343 = vmatprep.mubr.bf16.mxu0 %v4004_v30  ;;  %1507 = vmatprep.mubr.bf16.mxu1 %v4004_v30  ;;  %v4854_v30 = vld [vmem:[%s6947_s2 + $0x4a0] ss:$16 sps:$4 sm:$0xff]  }
  0x47   :  { %1314 = vmatpush1.bf16.msra.mxu0 %v4732_v9  ;;  %1478 = vmatpush1.bf16.msra.mxu1 %v4735_v10  ;;  %v4827_v9 = vld [vmem:[%s6947_s2 + $0x408] ss:$16 sps:$4 sm:$0xff]   ;;  %v4832_v10 = vld [vmem:[%s6947_s2 + $0x424] ss:$16 sps:$4 sm:$0xff]  }
  0x48   :  { %1315 = vmatprep.subr.bf16.mxu0 %v4740_v11  ;;  %1479 = vmatprep.subr.bf16.mxu1 %v4743_v12  ;;  %v5847_v11 = vld [vmem:[%s6945_s0 + $0x10] sm:$0xff]  ;;  %v4835_v12 = vld [vmem:[%s6947_s2 + $0x42c] ss:$16 sps:$4 sm:$0xff]  }
  0x4b   :  { %1316 = vmatpush1.bf16.msra.mxu0 %v4738_v13  ;;  %1480 = vmatpush1.bf16.msra.mxu1 %v4741_v14  ;;  %v4006_v13 = vcombine.high %v5847_v11, %v5847_v11  ;;  %v4830_v14 = vld [vmem:[%s6947_s2 + $0x420] ss:$16 sps:$4 sm:$0xff]  }
  0x4c   :  { %1317 = vmatprep.subr.bf16.mxu0 %v4746_v15  ;;  %1481 = vmatprep.subr.bf16.mxu1 %v4749_v16  ;;  %v4833_v15 = vld [vmem:[%s6947_s2 + $0x428] ss:$16 sps:$4 sm:$0xff]   ;;  %v4838_v16 = vld [vmem:[%s6947_s2 + $0x444] ss:$16 sps:$4 sm:$0xff]  }
  0x4f   :  { %1318 = vmatpush1.bf16.msra.mxu0 %v4744_v17  ;;  %1482 = vmatpush1.bf16.msra.mxu1 %v4747_v18  ;;  %v4841_v17 = vld [vmem:[%s6947_s2 + $0x44c] ss:$16 sps:$4 sm:$0xff]   ;;  %v4836_v18 = vld [vmem:[%s6947_s2 + $0x440] ss:$16 sps:$4 sm:$0xff]  }
  0x50   :  { %1319 = vmatprep.subr.bf16.mxu0 %v4752_v19  ;;  %1483 = vmatprep.subr.bf16.mxu1 %v4755_v20  ;;  %v4839_v19 = vld [vmem:[%s6947_s2 + $0x448] ss:$16 sps:$4 sm:$0xff]   ;;  %v4844_v20 = vld [vmem:[%s6947_s2 + $0x464] ss:$16 sps:$4 sm:$0xff]  }
  0x53   :  { %1320 = vmatpush1.bf16.msra.mxu0 %v4750_v21  ;;  %1484 = vmatpush1.bf16.msra.mxu1 %v4753_v22  ;;  %v4847_v21 = vld [vmem:[%s6947_s2 + $0x46c] ss:$16 sps:$4 sm:$0xff]   ;;  %v4842_v22 = vld [vmem:[%s6947_s2 + $0x460] ss:$16 sps:$4 sm:$0xff]  }
  0x54   :  { %1321 = vmatprep.subr.bf16.mxu0 %v4758_v23  ;;  %1485 = vmatprep.subr.bf16.mxu1 %v4761_v24  ;;  %v4845_v23 = vld [vmem:[%s6947_s2 + $0x468] ss:$16 sps:$4 sm:$0xff]   ;;  %v4850_v24 = vld [vmem:[%s6947_s2 + $0x484] ss:$16 sps:$4 sm:$0xff]  }
  0x57   :  { %1322 = vmatpush1.bf16.msra.mxu0 %v4756_v25  ;;  %1486 = vmatpush1.bf16.msra.mxu1 %v4759_v26  ;;  %v4853_v25 = vld [vmem:[%s6947_s2 + $0x48c] ss:$16 sps:$4 sm:$0xff]   ;;  %v4848_v26 = vld [vmem:[%s6947_s2 + $0x480] ss:$16 sps:$4 sm:$0xff]  }
  0x58   :  { %1323 = vmatprep.subr.bf16.mxu0 %v4764_v27  ;;  %1487 = vmatprep.subr.bf16.mxu1 %v4767_v28  ;;  %v4851_v27 = vld [vmem:[%s6947_s2 + $0x488] ss:$16 sps:$4 sm:$0xff]   ;;  %v4856_v28 = vld [vmem:[%s6947_s2 + $0x4a4] ss:$16 sps:$4 sm:$0xff]  }
  0x5b   :  { %1324 = vmatpush1.bf16.msra.mxu0 %v4762_v31  ;;  %1488 = vmatpush1.bf16.msra.mxu1 %v4765_v32  ;;  %v4857_v31 = vld [vmem:[%s6947_s2 + $0x4a8] ss:$16 sps:$4 sm:$0xff]   ;;  %v4862_v32 = vld [vmem:[%s6947_s2 + $0x4c4] ss:$16 sps:$4 sm:$0xff]  }
  0x5c   :  { %1325 = vmatprep.subr.bf16.mxu0 %v4770_v33  ;;  %1489 = vmatprep.subr.bf16.mxu1 %v4773_v34  ;;  %v4865_v33 = vld [vmem:[%s6947_s2 + $0x4cc] ss:$16 sps:$4 sm:$0xff]   ;;  %v4860_v34 = vld [vmem:[%s6947_s2 + $0x4c0] ss:$16 sps:$4 sm:$0xff]  }
  0x5f   :  { %1326 = vmatpush1.bf16.msra.mxu0 %v4768_v35  ;;  %1490 = vmatpush1.bf16.msra.mxu1 %v4771_v36  ;;  %v4863_v35 = vld [vmem:[%s6947_s2 + $0x4c8] ss:$16 sps:$4 sm:$0xff]   ;;  %v4868_v36 = vld [vmem:[%s6947_s2 + $0x4e4] ss:$16 sps:$4 sm:$0xff]  }
  0x60   :  { %1327 = vmatprep.subr.bf16.mxu0 %v4776_v37  ;;  %1491 = vmatprep.subr.bf16.mxu1 %v4779_v38  ;;  %v4871_v37 = vld [vmem:[%s6947_s2 + $0x4ec] ss:$16 sps:$4 sm:$0xff]   ;;  %v4866_v38 = vld [vmem:[%s6947_s2 + $0x4e0] ss:$16 sps:$4 sm:$0xff]  }
  0x63   :  { %1328 = vmatpush1.bf16.msra.mxu0 %v4774_v39  ;;  %1492 = vmatpush1.bf16.msra.mxu1 %v4777_v40  ;;  %v4869_v39 = vld [vmem:[%s6947_s2 + $0x4e8] ss:$16 sps:$4 sm:$0xff]   ;;  %v4874_v40 = vld [vmem:[%s6947_s2 + $0x504] ss:$16 sps:$4 sm:$0xff]  }
  0x64   :  { %1329 = vmatprep.subr.bf16.mxu0 %v4782_v41  ;;  %1493 = vmatprep.subr.bf16.mxu1 %v4785_v42  ;;  %v4877_v41 = vld [vmem:[%s6947_s2 + $0x50c] ss:$16 sps:$4 sm:$0xff]   ;;  %v4872_v42 = vld [vmem:[%s6947_s2 + $0x500] ss:$16 sps:$4 sm:$0xff]  }
  0x67   :  { %1330 = vmatpush1.bf16.msra.mxu0 %v4780_v43  ;;  %1494 = vmatpush1.bf16.msra.mxu1 %v4783_v44  ;;  %v4875_v43 = vld [vmem:[%s6947_s2 + $0x508] ss:$16 sps:$4 sm:$0xff]   ;;  %v4880_v44 = vld [vmem:[%s6947_s2 + $0x524] ss:$16 sps:$4 sm:$0xff]  }
  0x68   :  { %1331 = vmatprep.subr.bf16.mxu0 %v4788_v45  ;;  %1495 = vmatprep.subr.bf16.mxu1 %v4791_v46  ;;  %v4883_v45 = vld [vmem:[%s6947_s2 + $0x52c] ss:$16 sps:$4 sm:$0xff]   ;;  %v4878_v46 = vld [vmem:[%s6947_s2 + $0x520] ss:$16 sps:$4 sm:$0xff]  }
  0x6b   :  { %1332 = vmatpush1.bf16.msra.mxu0 %v4786_v47  ;;  %1496 = vmatpush1.bf16.msra.mxu1 %v4789_v48  ;;  %v4881_v47 = vld [vmem:[%s6947_s2 + $0x528] ss:$16 sps:$4 sm:$0xff]   ;;  %v4886_v48 = vld [vmem:[%s6947_s2 + $0x544] ss:$16 sps:$4 sm:$0xff]  }
  0x6c   :  { %1333 = vmatprep.subr.bf16.mxu0 %v4794_v49  ;;  %1497 = vmatprep.subr.bf16.mxu1 %v4797_v50  ;;  %v4889_v49 = vld [vmem:[%s6947_s2 + $0x54c] ss:$16 sps:$4 sm:$0xff]   ;;  %v4884_v50 = vld [vmem:[%s6947_s2 + $0x540] ss:$16 sps:$4 sm:$0xff]  }
  0x6f   :  { %1334 = vmatpush1.bf16.msra.mxu0 %v4792_v51  ;;  %1498 = vmatpush1.bf16.msra.mxu1 %v4795_v52  ;;  %v4887_v51 = vld [vmem:[%s6947_s2 + $0x548] ss:$16 sps:$4 sm:$0xff]   ;;  %v4892_v52 = vld [vmem:[%s6947_s2 + $0x564] ss:$16 sps:$4 sm:$0xff]  }
  0x70   :  { %1335 = vmatprep.subr.bf16.mxu0 %v4800_v53  ;;  %1499 = vmatprep.subr.bf16.mxu1 %v4803_v54  ;;  %v4895_v53 = vld [vmem:[%s6947_s2 + $0x56c] ss:$16 sps:$4 sm:$0xff]   ;;  %v4890_v54 = vld [vmem:[%s6947_s2 + $0x560] ss:$16 sps:$4 sm:$0xff]  }
  0x73   :  { %1336 = vmatpush1.bf16.msra.mxu0 %v4798_v55  ;;  %1500 = vmatpush1.bf16.msra.mxu1 %v4801_v56  ;;  %v4893_v55 = vld [vmem:[%s6947_s2 + $0x568] ss:$16 sps:$4 sm:$0xff]   ;;  %v4898_v56 = vld [vmem:[%s6947_s2 + $0x584] ss:$16 sps:$4 sm:$0xff]  }
  0x74   :  { %1337 = vmatprep.subr.bf16.mxu0 %v4806_v57  ;;  %1501 = vmatprep.subr.bf16.mxu1 %v4809_v58  ;;  %v4901_v57 = vld [vmem:[%s6947_s2 + $0x58c] ss:$16 sps:$4 sm:$0xff]   ;;  %v4896_v58 = vld [vmem:[%s6947_s2 + $0x580] ss:$16 sps:$4 sm:$0xff]  }
  0x77   :  { %1338 = vmatpush1.bf16.msra.mxu0 %v4804_v59  ;;  %1502 = vmatpush1.bf16.msra.mxu1 %v4807_v60  ;;  %v4899_v59 = vld [vmem:[%s6947_s2 + $0x588] ss:$16 sps:$4 sm:$0xff]   ;;  %v4904_v60 = vld [vmem:[%s6947_s2 + $0x5a4] ss:$16 sps:$4 sm:$0xff]  }
  0x78   :  { %1339 = vmatprep.subr.bf16.mxu0 %v4812_v61  ;;  %1503 = vmatprep.subr.bf16.mxu1 %v4815_v62  ;;  %v4907_v61 = vld [vmem:[%s6947_s2 + $0x5ac] ss:$16 sps:$4 sm:$0xff]   ;;  %v4902_v62 = vld [vmem:[%s6947_s2 + $0x5a0] ss:$16 sps:$4 sm:$0xff]  }
  0x7b   :  { %1340 = vmatpush1.bf16.msra.mxu0 %v4810_v63  ;;  %1504 = vmatpush1.bf16.msra.mxu1 %v4813_v0  ;;  %v4905_v63 = vld [vmem:[%s6947_s2 + $0x5a8] ss:$16 sps:$4 sm:$0xff]   ;;  %v4910_v0 = vld [vmem:[%s6947_s2 + $0x5c4] ss:$16 sps:$4 sm:$0xff]  }
  0x7c   :  { %1341 = vmatprep.subr.bf16.mxu0 %v4818_v1  ;;  %1505 = vmatprep.subr.bf16.mxu1 %v4821_v2  ;;  %v4913_v1 = vld [vmem:[%s6947_s2 + $0x5cc] ss:$16 sps:$4 sm:$0xff]   ;;  %v4908_v2 = vld [vmem:[%s6947_s2 + $0x5c0] ss:$16 sps:$4 sm:$0xff]  }
  0x7f   :  { %1342 = vmatpush1.bf16.msra.mxu0 %v4816_v3  ;;  %1506 = vmatpush1.bf16.msra.mxu1 %v4819_v4  ;;  %v4911_v3 = vld [vmem:[%s6947_s2 + $0x5c8] ss:$16 sps:$4 sm:$0xff]   ;;  %v4916_v4 = vld [vmem:[%s6947_s2 + $0x5e4] ss:$16 sps:$4 sm:$0xff]  }
  0x80   :  { %1352 = vmatprep.subr.bf16.mxu0 %v4826_v5  ;;  %1516 = vmatprep.subr.bf16.mxu1 %v4829_v6  ;;  %v4919_v5 = vld [vmem:[%s6947_s2 + $0x5ec] ss:$16 sps:$4 sm:$0xff]   ;;  %v4914_v6 = vld [vmem:[%s6947_s2 + $0x5e0] ss:$16 sps:$4 sm:$0xff]  }
  0x82   :  { %1344 = vmatmul.mubr.bf16.vlgmr.msra.gmra.mrb[0].mxu0 %v4003_v7  ;;  %1508 = vmatmul.mubr.bf16.vlgmr.msra.gmra.mrb[0].mxu1 %v4003_v7  ;;  %v4917_v7 = vld [vmem:[%s6947_s2 + $0x5e8] ss:$16 sps:$4 sm:$0xff]  }
  0x83   :  { %1353 = vmatpush1.bf16.msra.mxu0 %v4824_v8  ;;  %1517 = vmatpush1.bf16.msra.mxu1 %v4827_v9  ;;  %v4924_v8 = vld [vmem:[%s6947_s2 + $0x604] ss:$16 sps:$4 sm:$0xff]   ;;  %v4927_v9 = vld [vmem:[%s6947_s2 + $0x60c] ss:$16 sps:$4 sm:$0xff]  }
  0x84   :  { %1354 = vmatprep.subr.bf16.mxu0 %v4832_v10  ;;  %1518 = vmatprep.subr.bf16.mxu1 %v4835_v12  ;;  %v4922_v10 = vld [vmem:[%s6947_s2 + $0x600] ss:$16 sps:$4 sm:$0xff]   ;;  %v4925_v12 = vld [vmem:[%s6947_s2 + $0x608] ss:$16 sps:$4 sm:$0xff]  }
  0x85   :  { %1384 = vmatprep.mubr.bf16.mxu0 %v4006_v13  ;;  %1548 = vmatprep.mubr.bf16.mxu1 %v4006_v13  ;;  %v4005_v13 = vcombine.low %v5847_v11, %v5847_v11  ;;  %v4928_v11 = vld [vmem:[%s6945_s0 + $0x18] ss:$0 sps:$4 sm:$0xff]  }
  0x87   :  { %1355 = vmatpush1.bf16.msra.mxu0 %v4830_v14  ;;  %1519 = vmatpush1.bf16.msra.mxu1 %v4833_v15  ;;  %v4929_v14 = vld [vmem:[%s6949_s4 + $0x40] sm:$0xff]   ;;  %v5369_v15 = vmov 0  }
  0x88   :  { %1356 = vmatprep.subr.bf16.mxu0 %v4838_v16  ;;  %1520 = vmatprep.subr.bf16.mxu1 %v4841_v17  ;;  %v4930_v16 = vld [vmem:[%s6949_s4] sm:$0xff]   ;;  %v4931_v17 = vld [vmem:[%s6949_s4 + $0x48] sm:$0xff]  }
  0x8b   :  { %1357 = vmatpush1.bf16.msra.mxu0 %v4836_v18  ;;  %1521 = vmatpush1.bf16.msra.mxu1 %v4839_v19  ;;  %v4932_v18 = vld [vmem:[%s6949_s4 + $0x8] sm:$0xff]   ;;  %v4933_v19 = vld [vmem:[%s6949_s4 + $0x50] sm:$0xff]  }
  0x8c   :  { %1358 = vmatprep.subr.bf16.mxu0 %v4844_v20  ;;  %1522 = vmatprep.subr.bf16.mxu1 %v4847_v21  ;;  %v4934_v20 = vld [vmem:[%s6949_s4 + $0x10] sm:$0xff]   ;;  %v4935_v21 = vld [vmem:[%s6949_s4 + $0x58] sm:$0xff]  }
  0x8f   :  { %1359 = vmatpush1.bf16.msra.mxu0 %v4842_v22  ;;  %1523 = vmatpush1.bf16.msra.mxu1 %v4845_v23  ;;  %v4936_v22 = vld [vmem:[%s6949_s4 + $0x18] sm:$0xff]   ;;  %v4937_v23 = vld [vmem:[%s6949_s4 + $0x60] sm:$0xff]  }
  0x90   :  { %1360 = vmatprep.subr.bf16.mxu0 %v4850_v24  ;;  %1524 = vmatprep.subr.bf16.mxu1 %v4853_v25  ;;  %v4938_v24 = vld [vmem:[%s6949_s4 + $0x20] sm:$0xff]   ;;  %v4939_v25 = vld [vmem:[%s6949_s4 + $0x68] sm:$0xff]  }
  0x93   :  { %1361 = vmatpush1.bf16.msra.mxu0 %v4848_v26  ;;  %1525 = vmatpush1.bf16.msra.mxu1 %v4851_v27  ;;  %v4940_v26 = vld [vmem:[%s6949_s4 + $0x28] sm:$0xff]  }
  0x94   :  { %1362 = vmatprep.subr.bf16.mxu0 %v4856_v28  ;;  %1526 = vmatprep.subr.bf16.mxu1 %v4859_v29 }
  0x97   :  { %1363 = vmatpush1.bf16.msra.mxu0 %v4854_v30  ;;  %1527 = vmatpush1.bf16.msra.mxu1 %v4857_v31 }
  0x98   :  { %1364 = vmatprep.subr.bf16.mxu0 %v4862_v32  ;;  %1528 = vmatprep.subr.bf16.mxu1 %v4865_v33 }
  0x9b   :  { %1365 = vmatpush1.bf16.msra.mxu0 %v4860_v34  ;;  %1529 = vmatpush1.bf16.msra.mxu1 %v4863_v35 }
  0x9c   :  { %1366 = vmatprep.subr.bf16.mxu0 %v4868_v36  ;;  %1530 = vmatprep.subr.bf16.mxu1 %v4871_v37 }
  0x9f   :  { %1367 = vmatpush1.bf16.msra.mxu0 %v4866_v38  ;;  %1531 = vmatpush1.bf16.msra.mxu1 %v4869_v39 }
  0xa0   :  { %1368 = vmatprep.subr.bf16.mxu0 %v4874_v40  ;;  %1532 = vmatprep.subr.bf16.mxu1 %v4877_v41 }
  0xa3   :  { %1369 = vmatpush1.bf16.msra.mxu0 %v4872_v42  ;;  %1533 = vmatpush1.bf16.msra.mxu1 %v4875_v43 }
  0xa4   :  { %1370 = vmatprep.subr.bf16.mxu0 %v4880_v44  ;;  %1534 = vmatprep.subr.bf16.mxu1 %v4883_v45 }
  0xa7   :  { %1371 = vmatpush1.bf16.msra.mxu0 %v4878_v46  ;;  %1535 = vmatpush1.bf16.msra.mxu1 %v4881_v47 }
  0xa8   :  { %1372 = vmatprep.subr.bf16.mxu0 %v4886_v48  ;;  %1536 = vmatprep.subr.bf16.mxu1 %v4889_v49 }
  0xab   :  { %1373 = vmatpush1.bf16.msra.mxu0 %v4884_v50  ;;  %1537 = vmatpush1.bf16.msra.mxu1 %v4887_v51 }
  0xac   :  { %1374 = vmatprep.subr.bf16.mxu0 %v4892_v52  ;;  %1538 = vmatprep.subr.bf16.mxu1 %v4895_v53 }
  0xaf   :  { %1375 = vmatpush1.bf16.msra.mxu0 %v4890_v54  ;;  %1539 = vmatpush1.bf16.msra.mxu1 %v4893_v55 }
  0xb0   :  { %1376 = vmatprep.subr.bf16.mxu0 %v4898_v56  ;;  %1540 = vmatprep.subr.bf16.mxu1 %v4901_v57 }
  0xb3   :  { %1377 = vmatpush1.bf16.msra.mxu0 %v4896_v58  ;;  %1541 = vmatpush1.bf16.msra.mxu1 %v4899_v59 }
  0xb4   :  { %1378 = vmatprep.subr.bf16.mxu0 %v4904_v60  ;;  %1542 = vmatprep.subr.bf16.mxu1 %v4907_v61 }
  0xb7   :  { %1379 = vmatpush1.bf16.msra.mxu0 %v4902_v62  ;;  %1543 = vmatpush1.bf16.msra.mxu1 %v4905_v63 }
  0xb8   :  { %1380 = vmatprep.subr.bf16.mxu0 %v4910_v0  ;;  %1544 = vmatprep.subr.bf16.mxu1 %v4913_v1 }
  0xbb   :  { %1381 = vmatpush1.bf16.msra.mxu0 %v4908_v2  ;;  %1545 = vmatpush1.bf16.msra.mxu1 %v4911_v3 }
  0xbc   :  { %1382 = vmatprep.subr.bf16.mxu0 %v4916_v4  ;;  %1546 = vmatprep.subr.bf16.mxu1 %v4919_v5 }
  0xbf   :  { %1383 = vmatpush1.bf16.msra.mxu0 %v4914_v6  ;;  %1547 = vmatpush1.bf16.msra.mxu1 %v4917_v7 }
  0xc0   :  { %1393 = vmatprep.subr.bf16.mxu0 %v4924_v8  ;;  %1557 = vmatprep.subr.bf16.mxu1 %v4927_v9 }
  0xc2   :  { %1385 = vmatmul.mubr.bf16.vlgmr.msra.gmra.mrb[0].mxu0 %v4005_v13  ;;  %1549 = vmatmul.mubr.bf16.vlgmr.msra.gmra.mrb[0].mxu1 %v4005_v13 }
  0xc3   :  { %1394 = vmatpush1.bf16.msra.mxu0 %v4922_v10  ;;  %1558 = vmatpush1.bf16.msra.mxu1 %v4925_v12 }
  0xc4   :  { %1425 = vmatprep.mubr.bf16.mxu0 %v5369_v15  ;;  %1589 = vmatprep.mubr.bf16.mxu1 %v5369_v15 }
  0xc5   :  { %4490 = vmatprep.subr.bf16.mxu1 %v4929_v14 }
  0xce   :  { %4204 = vmatmul.mubr.msk.bf16.vlgmr.msra.gmra.mrb[0].mxu0 %vm1266_vm0, %v4928_v11  ;;  %4205 = vmatmul.mubr.msk.bf16.vlgmr.msra.gmra.mrb[0].mxu1 %vm1266_vm0, %v4928_v11 }
  0xcf   :  { %4491 = vmatpush3.bf16.msra.mxu1 %v4930_v16  ;;  %2067 = vmatprep.mubr.bf16.mxu0 %v5369_v15 }
  0xd0   :  { %4492 = vmatprep.subr.bf16.mxu1 %v4931_v17 }
  0xd3   :  { %4493 = vmatpush3.bf16.msra.mxu1 %v4932_v18 }
  0xd4   :  { %4494 = vmatprep.subr.bf16.mxu1 %v4933_v19 }
  0xd7   :  { %4495 = vmatpush3.bf16.msra.mxu1 %v4934_v20 }
  0xd8   :  { %4496 = vmatprep.subr.bf16.mxu1 %v4935_v21 }
  0xdb   :  { %4497 = vmatpush3.bf16.msra.mxu1 %v4936_v22 }
  0xdc   :  { %4498 = vmatprep.subr.bf16.mxu1 %v4937_v23 }
  0xdf   :  { %4499 = vmatpush3.bf16.msra.mxu1 %v4938_v24 }
  0xe0   :  { %4500 = vmatprep.subr.bf16.mxu1 %v4939_v25 }
  0xe3   :  { %4501 = vmatpush3.bf16.msra.mxu1 %v4940_v26 }
  0xe4   :  { %18 = vsyncpa [#allocation5], 0  ;;  %v4941_v27 = vld [vmem:[%s6949_s4 + $0x70] sm:$0xff]   ;;  %v4943_v29 = vld [vmem:[%s6949_s4 + $0x78] sm:$0xff]   ;;  %v242_v32 = vlaneseq  ;;  %vm2022_vm1 = vcmask 1041408   ;;  %vm2018_vm2 = vcmask 162816  }
  0xe5   :  { %v4942_v28 = vld [vmem:[%s6949_s4 + $0x30] sm:$0xff]   ;;  %4502 = vmatprep.subr.bf16.mxu1 %v4941_v27  ;;  %v4944_v30 = vld [vmem:[%s6949_s4 + $0x38] sm:$0xff]   ;;  %v4945_v31 = vld [vmem:[%s6949_s4 + $0xc0] sm:$0xff]  }
  0xe6   :  { %v6099_v33 = vshrl.u32 %v242_v32, 7  ;;  %v240_v35 = vld [vmem:[%s6948_s3] sm:$0xf]  ;;  %v4947_v58 = vld [vmem:[%s6949_s4 + $0xc8] sm:$0xff]   ;;  %v4949_v61 = vld [vmem:[%s6949_s4 + $0xd0] sm:$0xff]  }
  0xe7   :  { %4503 = vmatpush3.bf16.msra.mxu1 %v4942_v28  ;;  %v4946_v56 = vld [vmem:[%s6949_s4 + $0x80] sm:$0xff]   ;;  %v4948_v60 = vld [vmem:[%s6949_s4 + $0x88] sm:$0xff]   ;;  %v4950_v62 = vld [vmem:[%s6949_s4 + $0x90] sm:$0xff]  }
  0xe8   :  { %4504 = vmatprep.subr.bf16.mxu1 %v4943_v29  ;;  %v6102_v34 = vsub.s32 0, %v6099_v33  ;;  %v6108_v36 = vsub.s32 1, %v6099_v33  ;;  %v6111_v37 = vsub.s32 3, %v6099_v33  ;;  %v4951_v63 = vld [vmem:[%s6949_s4 + $0xd8] sm:$0xff]   ;;  %v4953_v1 = vld [vmem:[%s6949_s4 + $0xe0] sm:$0xff]   ;;  %v6144_v3 = vsub.s32 2, %v6099_v33 }
  0xe9   :  { %v4952_v0 = vld [vmem:[%s6949_s4 + $0x98] sm:$0xff]   ;;  %v4954_v2 = vld [vmem:[%s6949_s4 + $0xa0] sm:$0xff]   ;;  %v4955_v4 = vld [vmem:[%s6949_s4 + $0xe8] sm:$0xff]  }
  0xea   :  { %v245_v38 = vrot.slane %v240_v35, %v6102_v34  ;;  %v249_v39 = vrot.slane %v240_v35, %v6108_v36  ;;  %v257_v40 = vrot.slane %v240_v35, %v6111_v37  ;;  %v4956_v5 = vld [vmem:[%s6949_s4 + $0xa8] sm:$0xff]   ;;  %v253_v6 = vrot.slane %v240_v35, %v6144_v3  ;;  %v4957_v7 = vld [vmem:[%s6949_s4 + $0xf0] sm:$0xff]   ;;  %v4959_v10 = vld [vmem:[%s6949_s4 + $0xf8] sm:$0xff]  }
  0xeb   :  { %4505 = vmatpush3.bf16.msra.mxu1 %v4944_v30  ;;  %v4958_v8 = vld [vmem:[%s6949_s4 + $0xb0] sm:$0xff]   ;;  %v4960_v12 = vld [vmem:[%s6949_s4 + $0xb8] sm:$0xff]   ;;  %v4206_v23 = vld [vmem:[%s6950_s5] ss:$0 sm:$0xff] }
  0xec   :  { %4512 = vmatprep.subr.bf16.mxu1 %v4945_v31  ;;  %v4961_v11 = vld [vmem:[%s6951_s6] ss:$16 sps:$4 sm:$0xff]   ;;  %v4963_v16 = vld [vmem:[%s6951_s6 + $0x4] ss:$16 sps:$4 sm:$0xff]   ;;  %v4964_v17 = vld [vmem:[%s6951_s6 + $0x8] ss:$16 sps:$4 sm:$0xff]  }
  0xed   :  { %v4966_v18 = vld [vmem:[%s6951_s6 + $0xc] ss:$16 sps:$4 sm:$0xff]   ;;  %2035 = vmatprep.subr.bf16.mxu0 %v4963_v16  ;;  %v1964_v32 = vld [vmem:[%s6951_s6 + $0x20] sm:$0x33]  ;;  %v5010_v16 = vld [vmem:[%s6953_s8 + $0x158] ss:$28 sps:$4 sm:$0xff]  }
  0xee   :  { %2036 = vmatpush1.bf16.msra.mxu0 %v4961_v11  ;;  %v1965_v35 = vld [vmem:[%s6951_s6 + $0x28] sm:$0x33]  ;;  %s5370_s6 = smov 108  }
  0xef   :  { %v5007_v11 = vld [vmem:[%s6953_s8 + $0x150] ss:$28 sps:$4 sm:$0xff]  }
 0x1a1   :  { %v1427_v41 = vpop.f32.mrb[0].mxu0  ;;  %v1591_v42 = vpop.f32.mrb[0].mxu1 }
 0x1a2   :  { %v4578_v43 = vadd.f32 %v1427_v41, %v245_v38  ;;  %v1429_v44 = vpop.f32.mrb[1].mxu0  ;;  %v1593_v45 = vpop.f32.mrb[1].mxu1  ;;  %v4580_v9 = vadd.f32 %v1591_v42, %v253_v6  ;;  %v4243_v41 = vcombine.low %v1964_v32, %v1964_v32  ;;  %v4245_v42 = vcombine.low %v1965_v35, %v1965_v35  ;;  %v4995_v6 = vld [vmem:[%s6953_s8 + $0xe0] ss:$28 sps:$4 sm:$0xff]  }
 0x1a3   :  { %v4579_v46 = vadd.f32 %v1429_v44, %v249_v39  ;;  %v4581_v47 = vadd.f32 %v1593_v45, %v257_v40  ;;  %v1431_v48 = vpop.f32.mrb[2].mxu0  ;;  %v1595_v49 = vpop.f32.mrb[2].mxu1  ;;  %v4244_v39 = vcombine.high %v1964_v32, %v1964_v32  ;;  %v4246_v40 = vcombine.high %v1965_v35, %v1965_v35  ;;  %v4973_v45 = vld [vmem:[%s6953_s8 + $0x4] ss:$28 sps:$4 sm:$0xff]   ;;  %v5039_v32 = vld [vmem:[%s6953_s8 + $0x26c] ss:$28 sps:$4 sm:$0xff]  }
 0x1a4   :  { %v1598_v50 = vmax.f32 %v4578_v43, 0.0  ;;  %v1432_v51 = vpop.f32.mrb[3].mxu0  ;;  %v1596_v52 = vpop.f32.mrb[3].mxu1  ;;  %v1600_v13 = vmax.f32 %v4580_v9, 0.0  ;;  %v2024_v43 = vsel %vm2022_vm1, %v4243_v41, 0  ;;  %v2030_v44 = vsel %vm2022_vm1, %v4245_v42, 0 }
 0x1a5   :  { %v1599_v53 = vmax.f32 %v4579_v46, 0.0  ;;  %v1601_v54 = vmax.f32 %v4581_v47, 0.0  ;;  %4247 = vmatprep.subr.msk.bf16.mxu0 %vm2022_vm1, %v4244_v39  ;;  %v4976_v46 = vld [vmem:[%s6953_s8 + $0xc] ss:$28 sps:$4 sm:$0xff]   ;;  %v1952_v48 = vld [vmem:[%s6946_s1] sm:$0xff] }
 0x1a6   :  { %v1602_v57 = vpack.c.bf16 %v1598_v50, %v1598_v50  ;;  %v1604_v14 = vpack.c.bf16 %v1600_v13, %v1600_v13  ;;  %2038 = vmatpush1.bf16.msra.mxu0 %v2024_v43  ;;  %v4971_v52 = vld [vmem:[%s6953_s8] ss:$28 sps:$4 sm:$0xff]   ;;  %v5009_v13 = vld [vmem:[%s6953_s8 + $0x154] ss:$28 sps:$4 sm:$0xff]   ;;  %v5048_v41 = vld [vmem:[%s6953_s8 + $0x2ac] ss:$28 sps:$4 sm:$0xff]  }
 0x1a7   :  { %v1603_v55 = vpack.c.bf16 %v1599_v53, %v1599_v53  ;;  %v1605_v59 = vpack.c.bf16 %v1601_v54, %v1601_v54  ;;  %3570 = vmatprep.subr.bf16.mxu0 %v4973_v45  ;;  %v4974_v53 = vld [vmem:[%s6953_s8 + $0x8] ss:$28 sps:$4 sm:$0xff]   ;;  %v5042_v35 = vld [vmem:[%s6953_s8 + $0x274] ss:$28 sps:$4 sm:$0xff]   ;;  %v5043_v42 = vld [vmem:[%s6953_s8 + $0x2a0] ss:$28 sps:$4 sm:$0xff]  }
 0x1a8   :  { %v5006_v9 = vld [vmem:[%s6953_s8 + $0x124] ss:$28 sps:$4 sm:$0xff]   ;;  %v5040_v39 = vld [vmem:[%s6953_s8 + $0x270] ss:$28 sps:$4 sm:$0xff]  }
 0x1a9   :  { %1901 = vmatprep.mubr.bf16.mxu1 %v1603_v55  ;;  %v4979_v55 = vld [vmem:[%s6953_s8 + $0x3c] ss:$28 sps:$4 sm:$0xff]   ;;  %v5046_v43 = vld [vmem:[%s6953_s8 + $0x2a8] ss:$28 sps:$4 sm:$0xff]  }
 0x1aa   :  { %1902 = vmatmul.mubr.bf16.vlgmr.msra.gmra.mrb[4].mxu1 %v1602_v57  ;;  %v4977_v57 = vld [vmem:[%s6953_s8 + $0x38] ss:$28 sps:$4 sm:$0xff]   ;;  %v5054_v45 = vld [vmem:[%s6953_s8 + $0x2e4] ss:$28 sps:$4 sm:$0xff]  }
 0x1ab   :  { %4513 = vmatpush3.bf16.msra.mxu1 %v4946_v56  ;;  %1941 = vmatprep.mubr.bf16.mxu1 %v1605_v59  ;;  %v4982_v56 = vld [vmem:[%s6953_s8 + $0x44] ss:$28 sps:$4 sm:$0xff]   ;;  %v4985_v59 = vld [vmem:[%s6953_s8 + $0x74] ss:$28 sps:$4 sm:$0xff]  }
 0x1ac   :  { %4514 = vmatprep.subr.bf16.mxu1 %v4947_v58  ;;  %v4980_v58 = vld [vmem:[%s6953_s8 + $0x40] ss:$28 sps:$4 sm:$0xff]  }
 0x1af   :  { %4515 = vmatpush3.bf16.msra.mxu1 %v4948_v60  ;;  %v4988_v60 = vld [vmem:[%s6953_s8 + $0x7c] ss:$28 sps:$4 sm:$0xff]  }
 0x1b0   :  { %4516 = vmatprep.subr.bf16.mxu1 %v4949_v61  ;;  %v4983_v61 = vld [vmem:[%s6953_s8 + $0x70] ss:$28 sps:$4 sm:$0xff]  }
 0x1b3   :  { %4517 = vmatpush3.bf16.msra.mxu1 %v4950_v62  ;;  %v4986_v62 = vld [vmem:[%s6953_s8 + $0x78] ss:$28 sps:$4 sm:$0xff]  }
 0x1b4   :  { %4518 = vmatprep.subr.bf16.mxu1 %v4951_v63  ;;  %v4991_v63 = vld [vmem:[%s6953_s8 + $0xac] ss:$28 sps:$4 sm:$0xff]  }
 0x1b7   :  { %4519 = vmatpush3.bf16.msra.mxu1 %v4952_v0  ;;  %v4994_v0 = vld [vmem:[%s6953_s8 + $0xb4] ss:$28 sps:$4 sm:$0xff]  }
 0x1b8   :  { %4520 = vmatprep.subr.bf16.mxu1 %v4953_v1  ;;  %v4989_v1 = vld [vmem:[%s6953_s8 + $0xa8] ss:$28 sps:$4 sm:$0xff]  }
 0x1bb   :  { %4521 = vmatpush3.bf16.msra.mxu1 %v4954_v2  ;;  %v4992_v2 = vld [vmem:[%s6953_s8 + $0xb0] ss:$28 sps:$4 sm:$0xff]  }
 0x1bc   :  { %4522 = vmatprep.subr.bf16.mxu1 %v4955_v4  ;;  %v4997_v4 = vld [vmem:[%s6953_s8 + $0xe4] ss:$28 sps:$4 sm:$0xff]  }
 0x1bf   :  { %4523 = vmatpush3.bf16.msra.mxu1 %v4956_v5  ;;  %v5000_v5 = vld [vmem:[%s6953_s8 + $0xec] ss:$28 sps:$4 sm:$0xff]  }
 0x1c0   :  { %4524 = vmatprep.subr.bf16.mxu1 %v4957_v7  ;;  %v4998_v7 = vld [vmem:[%s6953_s8 + $0xe8] ss:$28 sps:$4 sm:$0xff]  }
 0x1c3   :  { %4525 = vmatpush3.bf16.msra.mxu1 %v4958_v8  ;;  %v5003_v8 = vld [vmem:[%s6953_s8 + $0x11c] ss:$28 sps:$4 sm:$0xff]  }
 0x1c4   :  { %4526 = vmatprep.subr.bf16.mxu1 %v4959_v10  ;;  %v5001_v10 = vld [vmem:[%s6953_s8 + $0x118] ss:$28 sps:$4 sm:$0xff]  }
 0x1c7   :  { %4527 = vmatpush3.bf16.msra.mxu1 %v4960_v12  ;;  %v5004_v12 = vld [vmem:[%s6953_s8 + $0x120] ss:$28 sps:$4 sm:$0xff]  }
 0x1c8   :  { %2076 = vmatprep.subr.bf16.mxu1 %v4966_v18  ;;  %v5018_v18 = vld [vmem:[%s6953_s8 + $0x194] ss:$28 sps:$4 sm:$0xff]  }
 0x1ca   :  { %1942 = vmatmul.mubr.bf16.vlgmr.msra.gmra.mrb[8].mxu1 %v1604_v14  ;;  %v5012_v14 = vld [vmem:[%s6953_s8 + $0x15c] ss:$28 sps:$4 sm:$0xff]  }
 0x1cb   :  { %2108 = vmatprep.mubr.bf16.mxu1 %v5369_v15  ;;  %2077 = vmatpush1.bf16.msra.mxu1 %v4964_v17  ;;  %v5015_v17 = vld [vmem:[%s6953_s8 + $0x18c] ss:$28 sps:$4 sm:$0xff]  }
 0x1cc   :  { %4249 = vmatprep.subr.msk.bf16.mxu1 %vm2022_vm1, %v4246_v40  ;;  %v5045_v40 = vld [vmem:[%s6953_s8 + $0x2a4] ss:$28 sps:$4 sm:$0xff]  }
 0x1cf   :  { %2079 = vmatpush1.bf16.msra.mxu1 %v2030_v44  ;;  %v5051_v44 = vld [vmem:[%s6953_s8 + $0x2dc] ss:$28 sps:$4 sm:$0xff]  }
 0x1d0   :  { %3652 = vmatprep.subr.bf16.mxu1 %v4976_v46  ;;  %v5049_v46 = vld [vmem:[%s6953_s8 + $0x2d8] ss:$28 sps:$4 sm:$0xff]  }
 0x27d   :  { %v4506_v15 = vpop.f32.mrb[4].mxu1 }
 0x27e   :  { %v4507_v19 = vpop.f32.mrb[5].mxu1 }
 0x27f   :  { %v4508_v20 = vadd.f32 %v4507_v19, %v4506_v15  ;;  %v4509_v21 = vpop.f32.mrb[6].mxu1  ;;  %v5013_v15 = vld [vmem:[%s6953_s8 + $0x188] ss:$28 sps:$4 sm:$0xff]   ;;  %v5016_v19 = vld [vmem:[%s6953_s8 + $0x190] ss:$28 sps:$4 sm:$0xff]  }
 0x280   :  { %v4510_v22 = vpop.f32.mrb[7].mxu1  ;;  %v5024_v21 = vld [vmem:[%s6953_s8 + $0x1cc] ss:$28 sps:$4 sm:$0xff]  }
 0x281   :  { %v1904_v26 = vadd.f32 %v4508_v20, %v4206_v23  ;;  %v5021_v20 = vld [vmem:[%s6953_s8 + $0x1c4] ss:$28 sps:$4 sm:$0xff]  }
 0x282   :  { %v5019_v22 = vld [vmem:[%s6953_s8 + $0x1c0] ss:$28 sps:$4 sm:$0xff]   ;;  %v5022_v23 = vld [vmem:[%s6953_s8 + $0x1c8] ss:$28 sps:$4 sm:$0xff]  }
 0x29d   :  { %v4528_v24 = vpop.f32.mrb[8].mxu1 }
 0x29e   :  { %v4529_v25 = vpop.f32.mrb[9].mxu1 }
 0x29f   :  { %v4530_v27 = vadd.f32 %v4529_v25, %v4528_v24  ;;  %v4531_v28 = vpop.f32.mrb[10].mxu1  ;;  %v5027_v24 = vld [vmem:[%s6953_s8 + $0x1fc] ss:$28 sps:$4 sm:$0xff]   ;;  %v5030_v25 = vld [vmem:[%s6953_s8 + $0x204] ss:$28 sps:$4 sm:$0xff]  }
 0x2a0   :  { %v4532_v29 = vpop.f32.mrb[11].mxu1  ;;  %v5033_v28 = vld [vmem:[%s6953_s8 + $0x234] ss:$28 sps:$4 sm:$0xff]  }
 0x2a1   :  { %v1944_v30 = vadd.f32 %v4530_v27, %v1904_v26  ;;  %v5025_v26 = vld [vmem:[%s6953_s8 + $0x1f8] ss:$28 sps:$4 sm:$0xff]   ;;  %v5028_v27 = vld [vmem:[%s6953_s8 + $0x200] ss:$28 sps:$4 sm:$0xff]  }
 0x2a2   :  { %v5036_v29 = vld [vmem:[%s6953_s8 + $0x23c] ss:$28 sps:$4 sm:$0xff]  }
 0x2a3   :  { %v1949_v31 = vmul.f32 0.5, %v1944_v30  ;;  %3972 = vst [vmem:[#allocation4] sm:$0xff] %v1944_v30 }
 0x2a5   :  { %v1950_v38 = vmul.f32 1.442695, %v1949_v31  ;;  %v5034_v31 = vld [vmem:[%s6953_s8 + $0x238] ss:$28 sps:$4 sm:$0xff]  }
 0x2a7   :  { %5291 = vpow2.f32 %v1950_v38  ;;  %v5037_v38 = vld [vmem:[%s6953_s8 + $0x268] ss:$28 sps:$4 sm:$0xff]  }
 0x2b1   :  { %v5292_v47 = vpop.eup %5291 }
 0x2b2   :  { %1954 = vrot.lane.b32.xlu0 %v5292_v47, %s5370_s6  ;;  %v5052_v47 = vld [vmem:[%s6953_s8 + $0x2e0] ss:$28 sps:$4 sm:$0xff]  }
 0x324   :  { %v1955_v49 = vpop.permute.xlu0 %1954 }
 0x325   :  { %v1957_v50 = vmul.f32 %v1955_v49, %v1952_v48  ;;  %v5057_v48 = vld [vmem:[%s6953_s8 + $0x314] ss:$28 sps:$4 sm:$0xff]   ;;  %v5060_v49 = vld [vmem:[%s6953_s8 + $0x31c] ss:$28 sps:$4 sm:$0xff]  }
 0x327   :  { %v1958_v51 = vadd.f32 %v1957_v50, %v1944_v30  ;;  %v5031_v30 = vld [vmem:[%s6953_s8 + $0x230] ss:$28 sps:$4 sm:$0xff]  }
 0x328   :  { %v5055_v50 = vld [vmem:[%s6953_s8 + $0x310] ss:$28 sps:$4 sm:$0xff]  }
 0x329   :  { %v1959_v54 = vpack.c.bf16 %v1958_v51, %v1958_v51  ;;  %v5058_v51 = vld [vmem:[%s6953_s8 + $0x318] ss:$28 sps:$4 sm:$0xff]  }
 0x32b   :  { %4248 = vmatmul.mubr.msk.bf16.vlgmr.msra.gmra.mrb[4].mxu0 %vm2018_vm2, %v1959_v54  ;;  %4250 = vmatmul.mubr.msk.bf16.vlgmr.msra.gmra.mrb[12].mxu1 %vm2018_vm2, %v1959_v54  ;;  %v5061_v54 = vld [vmem:[%s6953_s8 + $0x348] ss:$28 sps:$4 sm:$0xff]  }
 0x32c   :  { %3571 = vmatpush1.bf16.msra.mxu0 %v4971_v52  ;;  %3653 = vmatpush1.bf16.msra.mxu1 %v4974_v53  ;;  %v5063_v52 = vld [vmem:[%s6953_s8 + $0x34c] ss:$28 sps:$4 sm:$0xff]   ;;  %v5066_v53 = vld [vmem:[%s6953_s8 + $0x354] ss:$28 sps:$4 sm:$0xff]  }
 0x32d   :  { %3572 = vmatprep.subr.bf16.mxu0 %v4979_v55  ;;  %3654 = vmatprep.subr.bf16.mxu1 %v4982_v56  ;;  %v5064_v55 = vld [vmem:[%s6953_s8 + $0x350] ss:$28 sps:$4 sm:$0xff]   ;;  %v5069_v56 = vld [vmem:[%s6953_s8 + $0x384] ss:$28 sps:$4 sm:$0xff]  }
 0x330   :  { %3573 = vmatpush1.bf16.msra.mxu0 %v4977_v57  ;;  %3655 = vmatpush1.bf16.msra.mxu1 %v4980_v58  ;;  %v5072_v57 = vld [vmem:[%s6953_s8 + $0x38c] ss:$28 sps:$4 sm:$0xff]   ;;  %v6391_v58 = vld [vmem:[%s6952_s7] sm:$0xf] }
 0x331   :  { %3574 = vmatprep.subr.bf16.mxu0 %v4985_v59  ;;  %3656 = vmatprep.subr.bf16.mxu1 %v4988_v60  ;;  %v1971_v59 = vrot.slane %v6391_v58, %v6102_v34  ;;  %v1975_v60 = vrot.slane %v6391_v58, %v6108_v36 }
 0x334   :  { %3575 = vmatpush1.bf16.msra.mxu0 %v4983_v61  ;;  %3657 = vmatpush1.bf16.msra.mxu1 %v4986_v62  ;;  %v1983_v61 = vrot.slane %v6391_v58, %v6111_v37 }
 0x335   :  { %3576 = vmatprep.subr.bf16.mxu0 %v4991_v63  ;;  %3658 = vmatprep.subr.bf16.mxu1 %v4994_v0 }
 0x338   :  { %3577 = vmatpush1.bf16.msra.mxu0 %v4989_v1  ;;  %3659 = vmatpush1.bf16.msra.mxu1 %v4992_v2 }
 0x339   :  { %3578 = vmatprep.subr.bf16.mxu0 %v4997_v4  ;;  %3660 = vmatprep.subr.bf16.mxu1 %v5000_v5 }
 0x33c   :  { %3579 = vmatpush1.bf16.msra.mxu0 %v4995_v6  ;;  %3661 = vmatpush1.bf16.msra.mxu1 %v4998_v7 }
 0x33d   :  { %3580 = vmatprep.subr.bf16.mxu0 %v5003_v8  ;;  %3662 = vmatprep.subr.bf16.mxu1 %v5006_v9 }
 0x340   :  { %3581 = vmatpush1.bf16.msra.mxu0 %v5001_v10  ;;  %3663 = vmatpush1.bf16.msra.mxu1 %v5004_v12 }
 0x341   :  { %3582 = vmatprep.subr.bf16.mxu0 %v5009_v13  ;;  %3664 = vmatprep.subr.bf16.mxu1 %v5012_v14 }
 0x344   :  { %3583 = vmatpush1.bf16.msra.mxu0 %v5007_v11  ;;  %3665 = vmatpush1.bf16.msra.mxu1 %v5010_v16  ;;  %v5067_v11 = vld [vmem:[%s6953_s8 + $0x380] ss:$28 sps:$4 sm:$0xff]   ;;  %v5070_v16 = vld [vmem:[%s6953_s8 + $0x388] ss:$28 sps:$4 sm:$0xff]  }
 0x345   :  { %3584 = vmatprep.subr.bf16.mxu0 %v5015_v17  ;;  %3666 = vmatprep.subr.bf16.mxu1 %v5018_v18  ;;  %v5075_v18 = vld [vmem:[%s6953_s8 + $0x3bc] ss:$28 sps:$4 sm:$0xff]  }
 0x348   :  { %3585 = vmatpush1.bf16.msra.mxu0 %v5013_v15  ;;  %3667 = vmatpush1.bf16.msra.mxu1 %v5016_v19  ;;  %v5078_v15 = vld [vmem:[%s6953_s8 + $0x3c4] ss:$28 sps:$4 sm:$0xff]  }
 0x349   :  { %3586 = vmatprep.subr.bf16.mxu0 %v5021_v20  ;;  %3668 = vmatprep.subr.bf16.mxu1 %v5024_v21  ;;  %v5073_v20 = vld [vmem:[%s6953_s8 + $0x3b8] ss:$28 sps:$4 sm:$0xff]   ;;  %v5076_v21 = vld [vmem:[%s6953_s8 + $0x3c0] ss:$28 sps:$4 sm:$0xff]  }
 0x34c   :  { %3587 = vmatpush1.bf16.msra.mxu0 %v5019_v22  ;;  %3669 = vmatpush1.bf16.msra.mxu1 %v5022_v23  ;;  %v5081_v22 = vld [vmem:[%s6953_s8 + $0x3f4] ss:$28 sps:$4 sm:$0xff]   ;;  %v5084_v23 = vld [vmem:[%s6953_s8 + $0x3fc] ss:$28 sps:$4 sm:$0xff]  }
 0x34d   :  { %3588 = vmatprep.subr.bf16.mxu0 %v5027_v24  ;;  %3670 = vmatprep.subr.bf16.mxu1 %v5030_v25  ;;  %v5079_v24 = vld [vmem:[%s6953_s8 + $0x3f0] ss:$28 sps:$4 sm:$0xff]   ;;  %v5082_v25 = vld [vmem:[%s6953_s8 + $0x3f8] ss:$28 sps:$4 sm:$0xff]  }
 0x350   :  { %3589 = vmatpush1.bf16.msra.mxu0 %v5025_v26  ;;  %3671 = vmatpush1.bf16.msra.mxu1 %v5028_v27  ;;  %v5087_v26 = vld [vmem:[%s6953_s8 + $0x42c] ss:$28 sps:$4 sm:$0xff]   ;;  %v5090_v27 = vld [vmem:[%s6953_s8 + $0x434] ss:$28 sps:$4 sm:$0xff]  }
 0x351   :  { %3590 = vmatprep.subr.bf16.mxu0 %v5033_v28  ;;  %3672 = vmatprep.subr.bf16.mxu1 %v5036_v29  ;;  %v5085_v28 = vld [vmem:[%s6953_s8 + $0x428] ss:$28 sps:$4 sm:$0xff]   ;;  %v5088_v29 = vld [vmem:[%s6953_s8 + $0x430] ss:$28 sps:$4 sm:$0xff]  }
 0x354   :  { %3591 = vmatpush1.bf16.msra.mxu0 %v5031_v30  ;;  %3673 = vmatpush1.bf16.msra.mxu1 %v5034_v31  ;;  %v5093_v30 = vld [vmem:[%s6953_s8 + $0x464] ss:$28 sps:$4 sm:$0xff]   ;;  %v5096_v31 = vld [vmem:[%s6953_s8 + $0x46c] ss:$28 sps:$4 sm:$0xff]  }
 0x355   :  { %3592 = vmatprep.subr.bf16.mxu0 %v5039_v32  ;;  %3674 = vmatprep.subr.bf16.mxu1 %v5042_v35  ;;  %v5091_v32 = vld [vmem:[%s6953_s8 + $0x460] ss:$28 sps:$4 sm:$0xff]   ;;  %v5094_v35 = vld [vmem:[%s6953_s8 + $0x468] ss:$28 sps:$4 sm:$0xff]  }
 0x358   :  { %3593 = vmatpush1.bf16.msra.mxu0 %v5037_v38  ;;  %3675 = vmatpush1.bf16.msra.mxu1 %v5040_v39  ;;  %v5099_v38 = vld [vmem:[%s6953_s8 + $0x49c] ss:$28 sps:$4 sm:$0xff]   ;;  %v5102_v39 = vld [vmem:[%s6953_s8 + $0x4a4] ss:$28 sps:$4 sm:$0xff]  }
 0x359   :  { %3594 = vmatprep.subr.bf16.mxu0 %v5045_v40  ;;  %3676 = vmatprep.subr.bf16.mxu1 %v5048_v41  ;;  %v5097_v40 = vld [vmem:[%s6953_s8 + $0x498] ss:$28 sps:$4 sm:$0xff]   ;;  %v5100_v41 = vld [vmem:[%s6953_s8 + $0x4a0] ss:$28 sps:$4 sm:$0xff]  }
 0x35c   :  { %3595 = vmatpush1.bf16.msra.mxu0 %v5043_v42  ;;  %3677 = vmatpush1.bf16.msra.mxu1 %v5046_v43  ;;  %v5105_v42 = vld [vmem:[%s6953_s8 + $0x4d4] ss:$28 sps:$4 sm:$0xff]   ;;  %v5108_v43 = vld [vmem:[%s6953_s8 + $0x4dc] ss:$28 sps:$4 sm:$0xff]  }
 0x35d   :  { %3596 = vmatprep.subr.bf16.mxu0 %v5051_v44  ;;  %3678 = vmatprep.subr.bf16.mxu1 %v5054_v45  ;;  %v5103_v44 = vld [vmem:[%s6953_s8 + $0x4d0] ss:$28 sps:$4 sm:$0xff]   ;;  %v5106_v45 = vld [vmem:[%s6953_s8 + $0x4d8] ss:$28 sps:$4 sm:$0xff]  }
 0x360   :  { %3597 = vmatpush1.bf16.msra.mxu0 %v5049_v46  ;;  %3679 = vmatpush1.bf16.msra.mxu1 %v5052_v47  ;;  %v5111_v46 = vld [vmem:[%s6953_s8 + $0x50c] ss:$28 sps:$4 sm:$0xff]   ;;  %v5114_v47 = vld [vmem:[%s6953_s8 + $0x514] ss:$28 sps:$4 sm:$0xff]  }
 0x361   :  { %3598 = vmatprep.subr.bf16.mxu0 %v5057_v48  ;;  %3680 = vmatprep.subr.bf16.mxu1 %v5060_v49  ;;  %v5109_v48 = vld [vmem:[%s6953_s8 + $0x508] ss:$28 sps:$4 sm:$0xff]   ;;  %v5112_v49 = vld [vmem:[%s6953_s8 + $0x510] ss:$28 sps:$4 sm:$0xff]  }
 0x364   :  { %3599 = vmatpush1.bf16.msra.mxu0 %v5055_v50  ;;  %3681 = vmatpush1.bf16.msra.mxu1 %v5058_v51  ;;  %v5117_v50 = vld [vmem:[%s6953_s8 + $0x544] ss:$28 sps:$4 sm:$0xff]   ;;  %v5120_v51 = vld [vmem:[%s6953_s8 + $0x54c] ss:$28 sps:$4 sm:$0xff]  }
 0x365   :  { %3600 = vmatprep.subr.bf16.mxu0 %v5063_v52  ;;  %3682 = vmatprep.subr.bf16.mxu1 %v5066_v53  ;;  %v5115_v52 = vld [vmem:[%s6953_s8 + $0x540] ss:$28 sps:$4 sm:$0xff]   ;;  %v5118_v53 = vld [vmem:[%s6953_s8 + $0x548] ss:$28 sps:$4 sm:$0xff]  }
 0x368   :  { %3601 = vmatpush1.bf16.msra.mxu0 %v5061_v54  ;;  %3683 = vmatpush1.bf16.msra.mxu1 %v5064_v55  ;;  %v5123_v54 = vld [vmem:[%s6953_s8 + $0x57c] ss:$28 sps:$4 sm:$0xff]   ;;  %v5126_v55 = vld [vmem:[%s6953_s8 + $0x584] ss:$28 sps:$4 sm:$0xff]  }
 0x369   :  { %3611 = vmatprep.subr.bf16.mxu0 %v5069_v56  ;;  %3693 = vmatprep.subr.bf16.mxu1 %v5072_v57  ;;  %v5121_v56 = vld [vmem:[%s6953_s8 + $0x578] ss:$28 sps:$4 sm:$0xff]   ;;  %v5124_v57 = vld [vmem:[%s6953_s8 + $0x580] ss:$28 sps:$4 sm:$0xff]  }
 0x3fe   :  { %v2069_v62 = vpop.f32.mrb[4].mxu0  ;;  %v6399_v63 = vpop.f32.mrb[12].mxu1 }
 0x3ff   :  { %v2070_v0 = vadd.f32 %v2069_v62, %v1971_v59  ;;  %v2071_v1 = vpop.f32.mrb[5].mxu0  ;;  %v2112_v2 = vpop.f32.mrb[13].mxu1  ;;  %v5129_v59 = vld [vmem:[%s6953_s8 + $0x5b4] ss:$28 sps:$4 sm:$0xff]  }
 0x400   :  { %v2072_v4 = vadd.f32 %v2071_v1, %v1975_v60  ;;  %v2113_v5 = vadd.f32 %v2112_v2, %v1983_v61  ;;  %v2073_v6 = vpop.f32.mrb[6].mxu0  ;;  %v2114_v7 = vpop.f32.mrb[14].mxu1  ;;  %v5132_v60 = vld [vmem:[%s6953_s8 + $0x5bc] ss:$28 sps:$4 sm:$0xff]   ;;  %v5127_v61 = vld [vmem:[%s6953_s8 + $0x5b0] ss:$28 sps:$4 sm:$0xff]  }
 0x401   :  { %v2117_v8 = vmax.f32 %v2070_v0, 0.0  ;;  %v2074_v9 = vpop.f32.mrb[7].mxu0  ;;  %v2115_v10 = vpop.f32.mrb[15].mxu1  ;;  %v5130_v62 = vld [vmem:[%s6953_s8 + $0x5b8] ss:$28 sps:$4 sm:$0xff]  }
 0x402   :  { %v2118_v12 = vmax.f32 %v2072_v4, 0.0  ;;  %v2120_v13 = vmax.f32 %v2113_v5, 0.0  ;;  %v5135_v0 = vld [vmem:[%s6953_s8 + $0x5ec] ss:$28 sps:$4 sm:$0xff]   ;;  %v5138_v1 = vld [vmem:[%s6953_s8 + $0x5f4] ss:$28 sps:$4 sm:$0xff]  }
 0x403   :  { %v6409_v17 = vpack.c.bf16 %v2117_v8, %v2117_v8  ;;  %v5133_v2 = vld [vmem:[%s6953_s8 + $0x5e8] ss:$28 sps:$4 sm:$0xff]   ;;  %v5136_v4 = vld [vmem:[%s6953_s8 + $0x5f0] ss:$28 sps:$4 sm:$0xff]   ;;  %v5139_v7 = vld [vmem:[%s6953_s8 + $0x620] ss:$28 sps:$4 sm:$0xff]  }
 0x404   :  { %v6401_v14 = vpack.c.bf16 %v2118_v12, %v2118_v12  ;;  %v6419_v19 = vpack.c.bf16 %v2120_v13, %v2120_v13  ;;  %v5141_v5 = vld [vmem:[%s6953_s8 + $0x624] ss:$28 sps:$4 sm:$0xff]   ;;  %v5144_v6 = vld [vmem:[%s6953_s8 + $0x62c] ss:$28 sps:$4 sm:$0xff]   ;;  %v5147_v9 = vld [vmem:[%s6953_s8 + $0x65c] ss:$28 sps:$4 sm:$0xff]  }
 0x405   :  { %v5142_v8 = vld [vmem:[%s6953_s8 + $0x628] ss:$28 sps:$4 sm:$0xff]   ;;  %v5145_v12 = vld [vmem:[%s6953_s8 + $0x658] ss:$28 sps:$4 sm:$0xff]   ;;  %v5148_v13 = vld [vmem:[%s6953_s8 + $0x660] ss:$28 sps:$4 sm:$0xff]  }
 0x406   :  { %3602 = vmatprep.mubr.bf16.mxu0 %v6401_v14  ;;  %3684 = vmatprep.mubr.bf16.mxu1 %v6401_v14  ;;  %v5150_v10 = vld [vmem:[%s6953_s8 + $0x664] ss:$28 sps:$4 sm:$0xff]  }
 0x407   :  { %3603 = vmatmul.mubr.bf16.vlgmr.msra.gmra.mrb[8].mxu0 %v6409_v17  ;;  %3685 = vmatmul.mubr.bf16.vlgmr.msra.gmra.mrb[16].mxu1 %v6409_v17 }
 0x408   :  { %3612 = vmatpush1.bf16.msra.mxu0 %v5067_v11  ;;  %3694 = vmatpush1.bf16.msra.mxu1 %v5070_v16  ;;  %v1979_v11 = vrot.slane %v6391_v58, %v6144_v3  ;;  %v5153_v16 = vld [vmem:[%s6953_s8 + $0x694] ss:$28 sps:$4 sm:$0xff]  }
 0x409   :  { %3643 = vmatprep.mubr.bf16.mxu0 %v6419_v19  ;;  %3725 = vmatprep.mubr.bf16.mxu1 %v6419_v19  ;;  %v5154_v58 = vld [vmem:[%s6953_s8 + $0x698] ss:$28 sps:$4 sm:$0xff]  }
 0x40a   :  { %3613 = vmatprep.subr.bf16.mxu0 %v5075_v18  ;;  %3695 = vmatprep.subr.bf16.mxu1 %v5078_v15  ;;  %v5156_v18 = vld [vmem:[%s6953_s8 + $0x69c] ss:$28 sps:$4 sm:$0xff]   ;;  %v5151_v15 = vld [vmem:[%s6953_s8 + $0x690] ss:$28 sps:$4 sm:$0xff]  }
 0x40c   :  { %3614 = vmatpush1.bf16.msra.mxu0 %v5073_v20  ;;  %3696 = vmatpush1.bf16.msra.mxu1 %v5076_v21  ;;  %v2111_v20 = vadd.f32 %v6399_v63, %v1979_v11  ;;  %v5159_v21 = vld [vmem:[%s6953_s8 + $0x6cc] ss:$28 sps:$4 sm:$0xff]   ;;  %v5221_v11 = vld [vmem:[%s6953_s8 + $0x600] ss:$28 sps:$4 sm:$0xff]  }
 0x40d   :  { %3615 = vmatprep.subr.bf16.mxu0 %v5081_v22  ;;  %3697 = vmatprep.subr.bf16.mxu1 %v5084_v23  ;;  %v5162_v22 = vld [vmem:[%s6953_s8 + $0x6d4] ss:$28 sps:$4 sm:$0xff]   ;;  %v5157_v23 = vld [vmem:[%s6953_s8 + $0x6c8] ss:$28 sps:$4 sm:$0xff]  }
 0x40e   :  { %v5160_v63 = vld [vmem:[%s6953_s8 + $0x6d0] ss:$28 sps:$4 sm:$0xff]  }
 0x410   :  { %3616 = vmatpush1.bf16.msra.mxu0 %v5079_v24  ;;  %3698 = vmatpush1.bf16.msra.mxu1 %v5082_v25  ;;  %v2119_v24 = vmax.f32 %v2111_v20, 0.0  ;;  %v5165_v25 = vld [vmem:[%s6953_s8 + $0x14] ss:$28 sps:$4 sm:$0xff]  }
 0x411   :  { %3617 = vmatprep.subr.bf16.mxu0 %v5087_v26  ;;  %3699 = vmatprep.subr.bf16.mxu1 %v5090_v27  ;;  %v5166_v26 = vld [vmem:[%s6953_s8 + $0x1d8] ss:$28 sps:$4 sm:$0xff]   ;;  %v5163_v27 = vld [vmem:[%s6953_s8 + $0x10] ss:$28 sps:$4 sm:$0xff]  }
 0x412   :  { %v5223_v20 = vld [vmem:[%s6953_s8 + $0x2b0] ss:$28 sps:$4 sm:$0xff]  }
 0x414   :  { %3618 = vmatpush1.bf16.msra.mxu0 %v5085_v28  ;;  %3700 = vmatpush1.bf16.msra.mxu1 %v5088_v29  ;;  %v6611_v28 = vpack.c.bf16 %v2119_v24, %v2119_v24  ;;  %v5167_v29 = vld [vmem:[%s6953_s8 + $0x18] ss:$28 sps:$4 sm:$0xff]   ;;  %v5232_v24 = vld [vmem:[%s6953_s8 + $0x4b0] ss:$28 sps:$4 sm:$0xff]  }
 0x415   :  { %3619 = vmatprep.subr.bf16.mxu0 %v5093_v30  ;;  %3701 = vmatprep.subr.bf16.mxu1 %v5096_v31  ;;  %v5170_v30 = vld [vmem:[%s6953_s8 + $0x4c] ss:$28 sps:$4 sm:$0xff]  }
 0x416   :  { %v5171_v31 = vld [vmem:[%s6953_s8 + $0x210] ss:$28 sps:$4 sm:$0xff]  }
 0x418   :  { %3620 = vmatpush1.bf16.msra.mxu0 %v5091_v32  ;;  %3702 = vmatpush1.bf16.msra.mxu1 %v5094_v35  ;;  %v5168_v32 = vld [vmem:[%s6953_s8 + $0x48] ss:$28 sps:$4 sm:$0xff]   ;;  %v5172_v35 = vld [vmem:[%s6953_s8 + $0x50] ss:$28 sps:$4 sm:$0xff]  }
 0x419   :  { %3621 = vmatprep.subr.bf16.mxu0 %v5099_v38  ;;  %3703 = vmatprep.subr.bf16.mxu1 %v5102_v39  ;;  %v5175_v38 = vld [vmem:[%s6953_s8 + $0x84] ss:$28 sps:$4 sm:$0xff]  }
 0x41a   :  { %v5176_v39 = vld [vmem:[%s6953_s8 + $0x248] ss:$28 sps:$4 sm:$0xff]  }
 0x41c   :  { %3622 = vmatpush1.bf16.msra.mxu0 %v5097_v40  ;;  %3704 = vmatpush1.bf16.msra.mxu1 %v5100_v41  ;;  %v5173_v40 = vld [vmem:[%s6953_s8 + $0x80] ss:$28 sps:$4 sm:$0xff]  }
 0x41d   :  { %3623 = vmatprep.subr.bf16.mxu0 %v5105_v42  ;;  %3705 = vmatprep.subr.bf16.mxu1 %v5108_v43  ;;  %v5180_v41 = vld [vmem:[%s6953_s8 + $0xbc] ss:$28 sps:$4 sm:$0xff]  }
 0x41e   :  { %v5181_v42 = vld [vmem:[%s6953_s8 + $0x280] ss:$28 sps:$4 sm:$0xff]   ;;  %v5178_v43 = vld [vmem:[%s6953_s8 + $0xb8] ss:$28 sps:$4 sm:$0xff]  }
 0x420   :  { %3624 = vmatpush1.bf16.msra.mxu0 %v5103_v44  ;;  %3706 = vmatpush1.bf16.msra.mxu1 %v5106_v45  ;;  %v5182_v44 = vld [vmem:[%s6953_s8 + $0xc0] ss:$28 sps:$4 sm:$0xff]   ;;  %v5185_v45 = vld [vmem:[%s6953_s8 + $0xf4] ss:$28 sps:$4 sm:$0xff]  }
 0x421   :  { %3625 = vmatprep.subr.bf16.mxu0 %v5111_v46  ;;  %3707 = vmatprep.subr.bf16.mxu1 %v5114_v47  ;;  %v5186_v46 = vld [vmem:[%s6953_s8 + $0x2b8] ss:$28 sps:$4 sm:$0xff]   ;;  %v5183_v47 = vld [vmem:[%s6953_s8 + $0xf0] ss:$28 sps:$4 sm:$0xff]  }
 0x424   :  { %3626 = vmatpush1.bf16.msra.mxu0 %v5109_v48  ;;  %3708 = vmatpush1.bf16.msra.mxu1 %v5112_v49  ;;  %v5187_v48 = vld [vmem:[%s6953_s8 + $0xf8] ss:$28 sps:$4 sm:$0xff]   ;;  %v5190_v49 = vld [vmem:[%s6953_s8 + $0x12c] ss:$28 sps:$4 sm:$0xff]  }
 0x425   :  { %3627 = vmatprep.subr.bf16.mxu0 %v5117_v50  ;;  %3709 = vmatprep.subr.bf16.mxu1 %v5120_v51  ;;  %v5191_v50 = vld [vmem:[%s6953_s8 + $0x2f0] ss:$28 sps:$4 sm:$0xff]   ;;  %v5188_v51 = vld [vmem:[%s6953_s8 + $0x128] ss:$28 sps:$4 sm:$0xff]  }
 0x428   :  { %3628 = vmatpush1.bf16.msra.mxu0 %v5115_v52  ;;  %3710 = vmatpush1.bf16.msra.mxu1 %v5118_v53  ;;  %v5192_v52 = vld [vmem:[%s6953_s8 + $0x130] ss:$28 sps:$4 sm:$0xff]   ;;  %v5195_v53 = vld [vmem:[%s6953_s8 + $0x164] ss:$28 sps:$4 sm:$0xff]  }
 0x429   :  { %3629 = vmatprep.subr.bf16.mxu0 %v5123_v54  ;;  %3711 = vmatprep.subr.bf16.mxu1 %v5126_v55  ;;  %v5196_v54 = vld [vmem:[%s6953_s8 + $0x328] ss:$28 sps:$4 sm:$0xff]   ;;  %v5193_v55 = vld [vmem:[%s6953_s8 + $0x160] ss:$28 sps:$4 sm:$0xff]  }
 0x42c   :  { %3630 = vmatpush1.bf16.msra.mxu0 %v5121_v56  ;;  %3712 = vmatpush1.bf16.msra.mxu1 %v5124_v57  ;;  %v5197_v56 = vld [vmem:[%s6953_s8 + $0x168] ss:$28 sps:$4 sm:$0xff]   ;;  %v5200_v57 = vld [vmem:[%s6953_s8 + $0x19c] ss:$28 sps:$4 sm:$0xff]  }
 0x42d   :  { %3631 = vmatprep.subr.bf16.mxu0 %v5129_v59  ;;  %3713 = vmatprep.subr.bf16.mxu1 %v5132_v60  ;;  %v5201_v59 = vld [vmem:[%s6953_s8 + $0x360] ss:$28 sps:$4 sm:$0xff]   ;;  %v5198_v60 = vld [vmem:[%s6953_s8 + $0x198] ss:$28 sps:$4 sm:$0xff]  }
 0x430   :  { %3632 = vmatpush1.bf16.msra.mxu0 %v5127_v61  ;;  %3714 = vmatpush1.bf16.msra.mxu1 %v5130_v62  ;;  %v5202_v61 = vld [vmem:[%s6953_s8 + $0x1a0] ss:$28 sps:$4 sm:$0xff]   ;;  %v5205_v62 = vld [vmem:[%s6953_s8 + $0x1d4] ss:$28 sps:$4 sm:$0xff]  }
 0x431   :  { %3633 = vmatprep.subr.bf16.mxu0 %v5135_v0  ;;  %3715 = vmatprep.subr.bf16.mxu1 %v5138_v1  ;;  %v5206_v0 = vld [vmem:[%s6953_s8 + $0x558] ss:$28 sps:$4 sm:$0xff]   ;;  %v5203_v1 = vld [vmem:[%s6953_s8 + $0x1d0] ss:$28 sps:$4 sm:$0xff]  }
 0x434   :  { %3634 = vmatpush1.bf16.msra.mxu0 %v5133_v2  ;;  %3716 = vmatpush1.bf16.msra.mxu1 %v5136_v4  ;;  %v5207_v2 = vld [vmem:[%s6953_s8 + $0x398] ss:$28 sps:$4 sm:$0xff]   ;;  %v5210_v4 = vld [vmem:[%s6953_s8 + $0x20c] ss:$28 sps:$4 sm:$0xff]  }
 0x435   :  { %3635 = vmatprep.subr.bf16.mxu0 %v5141_v5  ;;  %3717 = vmatprep.subr.bf16.mxu1 %v5144_v6  ;;  %v5211_v5 = vld [vmem:[%s6953_s8 + $0x590] ss:$28 sps:$4 sm:$0xff]   ;;  %v5208_v6 = vld [vmem:[%s6953_s8 + $0x208] ss:$28 sps:$4 sm:$0xff]  }
 0x438   :  { %3636 = vmatpush1.bf16.msra.mxu0 %v5139_v7  ;;  %3718 = vmatpush1.bf16.msra.mxu1 %v5142_v8  ;;  %v5212_v7 = vld [vmem:[%s6953_s8 + $0x3d0] ss:$28 sps:$4 sm:$0xff]   ;;  %v5215_v8 = vld [vmem:[%s6953_s8 + $0x244] ss:$28 sps:$4 sm:$0xff]  }
 0x439   :  { %3637 = vmatprep.subr.bf16.mxu0 %v5147_v9  ;;  %3719 = vmatprep.subr.bf16.mxu1 %v5150_v10  ;;  %v5216_v9 = vld [vmem:[%s6953_s8 + $0x5c8] ss:$28 sps:$4 sm:$0xff]   ;;  %v5213_v10 = vld [vmem:[%s6953_s8 + $0x240] ss:$28 sps:$4 sm:$0xff]  }
 0x43c   :  { %3638 = vmatpush1.bf16.msra.mxu0 %v5145_v12  ;;  %3720 = vmatpush1.bf16.msra.mxu1 %v5148_v13  ;;  %v5217_v12 = vld [vmem:[%s6953_s8 + $0x408] ss:$28 sps:$4 sm:$0xff]   ;;  %v5220_v13 = vld [vmem:[%s6953_s8 + $0x27c] ss:$28 sps:$4 sm:$0xff]  }
 0x43d   :  { %3639 = vmatprep.subr.bf16.mxu0 %v5153_v16  ;;  %3721 = vmatprep.subr.bf16.mxu1 %v5156_v18  ;;  %v5218_v16 = vld [vmem:[%s6953_s8 + $0x278] ss:$28 sps:$4 sm:$0xff]   ;;  %v5222_v18 = vld [vmem:[%s6953_s8 + $0x440] ss:$28 sps:$4 sm:$0xff]  }
 0x440   :  { %3640 = vmatpush1.bf16.msra.mxu0 %v5151_v15  ;;  %3722 = vmatpush1.bf16.msra.mxu1 %v5154_v58  ;;  %v5225_v15 = vld [vmem:[%s6953_s8 + $0x2b4] ss:$28 sps:$4 sm:$0xff]  }
 0x441   :  { %3641 = vmatprep.subr.bf16.mxu0 %v5159_v21  ;;  %3723 = vmatprep.subr.bf16.mxu1 %v5162_v22  ;;  %v5226_v58 = vld [vmem:[%s6953_s8 + $0x638] ss:$28 sps:$4 sm:$0xff]   ;;  %v5230_v22 = vld [vmem:[%s6953_s8 + $0x2ec] ss:$28 sps:$4 sm:$0xff]  }
 0x442   :  { %v5227_v21 = vld [vmem:[%s6953_s8 + $0x478] ss:$28 sps:$4 sm:$0xff]  }
 0x444   :  { %3642 = vmatpush1.bf16.msra.mxu0 %v5157_v23  ;;  %3724 = vmatpush1.bf16.msra.mxu1 %v5160_v63  ;;  %v5231_v23 = vld [vmem:[%s6953_s8 + $0x670] ss:$28 sps:$4 sm:$0xff]   ;;  %v5228_v63 = vld [vmem:[%s6953_s8 + $0x2e8] ss:$28 sps:$4 sm:$0xff]  }
 0x445   :  { %3734 = vmatprep.subr.bf16.mxu0 %v5165_v25  ;;  %4534 = vmatprep.subr.bf16.mxu1 %v5166_v26  ;;  %v5235_v25 = vld [vmem:[%s6953_s8 + $0x324] ss:$28 sps:$4 sm:$0xff]  }
 0x446   :  { %v5236_v26 = vld [vmem:[%s6953_s8 + $0x6a8] ss:$28 sps:$4 sm:$0xff]  }
 0x447   :  { %3644 = vmatmul.mubr.bf16.vlgmr.msra.gmra.mrb[8].mxu0 %v6611_v28  ;;  %3726 = vmatmul.mubr.bf16.vlgmr.msra.gmra.mrb[16].mxu1 %v6611_v28 }
 0x448   :  { %3735 = vmatpush1.bf16.msra.mxu0 %v5163_v27  ;;  %3766 = vmatprep.mubr.bf16.mxu0 %v6401_v14  ;;  %v5233_v27 = vld [vmem:[%s6953_s8 + $0x320] ss:$28 sps:$4 sm:$0xff]  }
 0x449   :  { %4535 = vmatpush3.bf16.msra.mxu1 %v5167_v29  ;;  %3848 = vmatprep.mubr.bf16.mxu1 %v6401_v14  ;;  %v5177_v14 = vld [vmem:[%s6953_s8 + $0x88] ss:$28 sps:$4 sm:$0xff]  }
 0x44a   :  { %3736 = vmatprep.subr.bf16.mxu0 %v5170_v30  ;;  %4536 = vmatprep.subr.bf16.mxu1 %v5171_v31  ;;  %v5237_v29 = vld [vmem:[%s6953_s8 + $0x4e8] ss:$28 sps:$4 sm:$0xff]   ;;  %v5240_v30 = vld [vmem:[%s6953_s8 + $0x35c] ss:$28 sps:$4 sm:$0xff]  }
 0x44b   :  { %v5241_v31 = vld [vmem:[%s6953_s8 + $0x6e0] ss:$28 sps:$4 sm:$0xff]  }
 0x44c   :  { %3737 = vmatpush1.bf16.msra.mxu0 %v5168_v32  ;;  %v5238_v32 = vld [vmem:[%s6953_s8 + $0x358] ss:$28 sps:$4 sm:$0xff]  }
 0x44d   :  { %4537 = vmatpush3.bf16.msra.mxu1 %v5172_v35  ;;  %3738 = vmatprep.subr.bf16.mxu0 %v5175_v38  ;;  %v5242_v35 = vld [vmem:[%s6953_s8 + $0x520] ss:$28 sps:$4 sm:$0xff]   ;;  %v5245_v38 = vld [vmem:[%s6953_s8 + $0x394] ss:$28 sps:$4 sm:$0xff]  }
 0x44e   :  { %4538 = vmatprep.subr.bf16.mxu1 %v5176_v39  ;;  %v5243_v39 = vld [vmem:[%s6953_s8 + $0x390] ss:$28 sps:$4 sm:$0xff]  }
 0x450   :  { %3739 = vmatpush1.bf16.msra.mxu0 %v5173_v40  ;;  %v5248_v40 = vld [vmem:[%s6953_s8 + $0x3cc] ss:$28 sps:$4 sm:$0xff]  }
 0x451   :  { %4539 = vmatpush3.bf16.msra.mxu1 %v5177_v14  ;;  %3740 = vmatprep.subr.bf16.mxu0 %v5180_v41  ;;  %v5246_v14 = vld [vmem:[%s6953_s8 + $0x3c8] ss:$28 sps:$4 sm:$0xff]  }
 0x452   :  { %4540 = vmatprep.subr.bf16.mxu1 %v5181_v42  ;;  %v5251_v41 = vld [vmem:[%s6953_s8 + $0x404] ss:$28 sps:$4 sm:$0xff]  }
 0x453   :  { %v5249_v42 = vld [vmem:[%s6953_s8 + $0x400] ss:$28 sps:$4 sm:$0xff]  }
 0x454   :  { %3741 = vmatpush1.bf16.msra.mxu0 %v5178_v43  ;;  %v5257_v43 = vld [vmem:[%s6953_s8 + $0x474] ss:$28 sps:$4 sm:$0xff]  }
 0x455   :  { %4541 = vmatpush3.bf16.msra.mxu1 %v5182_v44  ;;  %3742 = vmatprep.subr.bf16.mxu0 %v5185_v45  ;;  %v5255_v44 = vld [vmem:[%s6953_s8 + $0x470] ss:$28 sps:$4 sm:$0xff]  }
 0x456   :  { %4542 = vmatprep.subr.bf16.mxu1 %v5186_v46  ;;  %v5260_v45 = vld [vmem:[%s6953_s8 + $0x4ac] ss:$28 sps:$4 sm:$0xff]  }
 0x457   :  { %v5258_v46 = vld [vmem:[%s6953_s8 + $0x4a8] ss:$28 sps:$4 sm:$0xff]  }
 0x458   :  { %3743 = vmatpush1.bf16.msra.mxu0 %v5183_v47  ;;  %v5263_v47 = vld [vmem:[%s6953_s8 + $0x4e4] ss:$28 sps:$4 sm:$0xff]  }
 0x459   :  { %4543 = vmatpush3.bf16.msra.mxu1 %v5187_v48  ;;  %3744 = vmatprep.subr.bf16.mxu0 %v5190_v49  ;;  %v5261_v48 = vld [vmem:[%s6953_s8 + $0x4e0] ss:$28 sps:$4 sm:$0xff]  }
 0x45a   :  { %4544 = vmatprep.subr.bf16.mxu1 %v5191_v50  ;;  %v5266_v49 = vld [vmem:[%s6953_s8 + $0x51c] ss:$28 sps:$4 sm:$0xff]  }
 0x45b   :  { %v5264_v50 = vld [vmem:[%s6953_s8 + $0x518] ss:$28 sps:$4 sm:$0xff]  }
 0x45c   :  { %3745 = vmatpush1.bf16.msra.mxu0 %v5188_v51  ;;  %v5269_v51 = vld [vmem:[%s6953_s8 + $0x554] ss:$28 sps:$4 sm:$0xff]  }
 0x45d   :  { %4545 = vmatpush3.bf16.msra.mxu1 %v5192_v52  ;;  %3746 = vmatprep.subr.bf16.mxu0 %v5195_v53  ;;  %v5267_v52 = vld [vmem:[%s6953_s8 + $0x550] ss:$28 sps:$4 sm:$0xff]  }
 0x45e   :  { %4546 = vmatprep.subr.bf16.mxu1 %v5196_v54  ;;  %v5272_v53 = vld [vmem:[%s6953_s8 + $0x58c] ss:$28 sps:$4 sm:$0xff]  }
 0x45f   :  { %v5270_v54 = vld [vmem:[%s6953_s8 + $0x588] ss:$28 sps:$4 sm:$0xff]  }
 0x460   :  { %3747 = vmatpush1.bf16.msra.mxu0 %v5193_v55  ;;  %v5275_v55 = vld [vmem:[%s6953_s8 + $0x5c4] ss:$28 sps:$4 sm:$0xff]  }
 0x461   :  { %4547 = vmatpush3.bf16.msra.mxu1 %v5197_v56  ;;  %3748 = vmatprep.subr.bf16.mxu0 %v5200_v57  ;;  %v5273_v56 = vld [vmem:[%s6953_s8 + $0x5c0] ss:$28 sps:$4 sm:$0xff]  }
 0x462   :  { %4548 = vmatprep.subr.bf16.mxu1 %v5201_v59  ;;  %v5278_v57 = vld [vmem:[%s6953_s8 + $0x5fc] ss:$28 sps:$4 sm:$0xff]  }
 0x463   :  { %v5276_v59 = vld [vmem:[%s6953_s8 + $0x5f8] ss:$28 sps:$4 sm:$0xff]  }
 0x464   :  { %3749 = vmatpush1.bf16.msra.mxu0 %v5198_v60  ;;  %v5281_v60 = vld [vmem:[%s6953_s8 + $0x634] ss:$28 sps:$4 sm:$0xff]  }
 0x465   :  { %4549 = vmatpush3.bf16.msra.mxu1 %v5202_v61  ;;  %3750 = vmatprep.subr.bf16.mxu0 %v5205_v62  ;;  %v5279_v61 = vld [vmem:[%s6953_s8 + $0x630] ss:$28 sps:$4 sm:$0xff]  }
 0x466   :  { %4556 = vmatprep.subr.bf16.mxu1 %v5206_v0  ;;  %v5284_v62 = vld [vmem:[%s6953_s8 + $0x66c] ss:$28 sps:$4 sm:$0xff]  }
 0x467   :  { %v5282_v0 = vld [vmem:[%s6953_s8 + $0x668] ss:$28 sps:$4 sm:$0xff]  }
 0x468   :  { %3849 = vmatmul.mubr.bf16.vlgmr.msra.gmra.mrb[20].mxu1 %v6409_v17  ;;  %3751 = vmatpush1.bf16.msra.mxu0 %v5203_v1  ;;  %v5287_v1 = vld [vmem:[%s6953_s8 + $0x6a4] ss:$28 sps:$4 sm:$0xff]  }
 0x469   :  { %4557 = vmatpush3.bf16.msra.mxu1 %v5207_v2  ;;  %3888 = vmatprep.mubr.bf16.mxu1 %v6419_v19  ;;  %v5285_v2 = vld [vmem:[%s6953_s8 + $0x6a0] ss:$28 sps:$4 sm:$0xff]  }
 0x46a   :  { %3752 = vmatprep.subr.bf16.mxu0 %v5210_v4  ;;  %4558 = vmatprep.subr.bf16.mxu1 %v5211_v5  ;;  %v5290_v4 = vld [vmem:[%s6953_s8 + $0x6dc] ss:$28 sps:$4 sm:$0xff]  }
 0x46b   :  { %v5288_v5 = vld [vmem:[%s6953_s8 + $0x6d8] ss:$28 sps:$4 sm:$0xff]  }
 0x46c   :  { %3753 = vmatpush1.bf16.msra.mxu0 %v5208_v6  ;;  %v6905_v6 = vld [vmem:[%s6954_s9] sm:$0x7f] }
 0x46d   :  { %4559 = vmatpush3.bf16.msra.mxu1 %v5212_v7  ;;  %3754 = vmatprep.subr.bf16.mxu0 %v5215_v8  ;;  %v2386_v7 = vrot.slane %v6905_v6, %v6102_v34  ;;  %v2394_v8 = vrot.slane %v6905_v6, %v6144_v3 }
 0x46e   :  { %4560 = vmatprep.subr.bf16.mxu1 %v5216_v9  ;;  %v2390_v9 = vrot.slane %v6905_v6, %v6108_v36 }
 0x470   :  { %3755 = vmatpush1.bf16.msra.mxu0 %v5213_v10  ;;  %v2398_v10 = vrot.slane %v6905_v6, %v6111_v37 }
 0x471   :  { %4561 = vmatpush3.bf16.msra.mxu1 %v5217_v12  ;;  %3756 = vmatprep.subr.bf16.mxu0 %v5220_v13 }
 0x472   :  { %4562 = vmatprep.subr.bf16.mxu1 %v5221_v11 }
 0x474   :  { %3757 = vmatpush1.bf16.msra.mxu0 %v5218_v16 }
 0x475   :  { %4563 = vmatpush3.bf16.msra.mxu1 %v5222_v18  ;;  %3758 = vmatprep.subr.bf16.mxu0 %v5225_v15 }
 0x476   :  { %4564 = vmatprep.subr.bf16.mxu1 %v5226_v58 }
 0x478   :  { %3759 = vmatpush1.bf16.msra.mxu0 %v5223_v20 }
 0x479   :  { %4565 = vmatpush3.bf16.msra.mxu1 %v5227_v21  ;;  %3760 = vmatprep.subr.bf16.mxu0 %v5230_v22 }
 0x47a   :  { %4566 = vmatprep.subr.bf16.mxu1 %v5231_v23 }
 0x47c   :  { %3761 = vmatpush1.bf16.msra.mxu0 %v5228_v63 }
 0x47d   :  { %4567 = vmatpush3.bf16.msra.mxu1 %v5232_v24  ;;  %3762 = vmatprep.subr.bf16.mxu0 %v5235_v25 }
 0x47e   :  { %4568 = vmatprep.subr.bf16.mxu1 %v5236_v26 }
 0x480   :  { %3763 = vmatpush1.bf16.msra.mxu0 %v5233_v27 }
 0x481   :  { %4569 = vmatpush3.bf16.msra.mxu1 %v5237_v29  ;;  %3764 = vmatprep.subr.bf16.mxu0 %v5240_v30 }
 0x482   :  { %4570 = vmatprep.subr.bf16.mxu1 %v5241_v31 }
 0x484   :  { %3765 = vmatpush1.bf16.msra.mxu0 %v5238_v32 }
 0x485   :  { %4571 = vmatpush3.bf16.msra.mxu1 %v5242_v35  ;;  %3775 = vmatprep.subr.bf16.mxu0 %v5245_v38 }
 0x487   :  { %3767 = vmatmul.mubr.bf16.vlgmr.msra.gmra.mrb[12].mxu0 %v6409_v17  ;;  %v5254_v17 = vld [vmem:[%s6953_s8 + $0x43c] ss:$28 sps:$4 sm:$0xff]  }
 0x488   :  { %3889 = vmatmul.mubr.bf16.vlgmr.msra.gmra.mrb[24].mxu1 %v6611_v28  ;;  %3776 = vmatpush1.bf16.msra.mxu0 %v5243_v39 }
 0x489   :  { %3807 = vmatprep.mubr.bf16.mxu0 %v6419_v19  ;;  %3777 = vmatprep.subr.bf16.mxu0 %v5248_v40  ;;  %v5252_v19 = vld [vmem:[%s6953_s8 + $0x438] ss:$28 sps:$4 sm:$0xff]   ;;  %s5371_s8 = smov [#allocation4]  }
 0x48a   :  { %s3989_s9 = sshll.u32 %s5371_s8, 4  ;;  %s3990_s9 = int_to_ptr.vmem [resolvable:$true] %s3989_s9 }
 0x48b   :  { %s5321_s30 = scalar_lea.vmem %s3990_s9, 128  ;;  %p5326_p1 = scmp.lt.s32.totalorder %s3990_s9, %s3990_s9 }
 0x48c   :  { %3778 = vmatpush1.bf16.msra.mxu0 %v5246_v14  ;;  %p5322_p0 = scmp.ne.s32.totalorder %s3990_s9, %s5321_s30  ;;  %p5327_p2 = scmp.lt.s32.totalorder %s5321_s30, %s5321_s30 }
 0x48d   :  { %3779 = vmatprep.subr.bf16.mxu0 %v5251_v41 }
 0x48e   :  { %p5328_p3 = por %p5327_p2, %p5326_p1 }
 0x490   :  { %3780 = vmatpush1.bf16.msra.mxu0 %v5249_v42  ;;  %p5329_p4 = pnand %p5328_p3, %p5322_p0 }
 0x491   :  { %3781 = vmatprep.subr.bf16.mxu0 %v5254_v17 }
 0x494   :  { %3782 = vmatpush1.bf16.msra.mxu0 %v5252_v19 }
 0x495   :  { %3783 = vmatprep.subr.bf16.mxu0 %v5257_v43 }
 0x498   :  { %3784 = vmatpush1.bf16.msra.mxu0 %v5255_v44 }
 0x499   :  { %3785 = vmatprep.subr.bf16.mxu0 %v5260_v45 }
 0x49c   :  { %3786 = vmatpush1.bf16.msra.mxu0 %v5258_v46 }
 0x49d   :  { %3787 = vmatprep.subr.bf16.mxu0 %v5263_v47 }
 0x4a0   :  { %3788 = vmatpush1.bf16.msra.mxu0 %v5261_v48 }
 0x4a1   :  { %3789 = vmatprep.subr.bf16.mxu0 %v5266_v49 }
 0x4a4   :  { %3790 = vmatpush1.bf16.msra.mxu0 %v5264_v50 }
 0x4a5   :  { %3791 = vmatprep.subr.bf16.mxu0 %v5269_v51 }
 0x4a8   :  { %3792 = vmatpush1.bf16.msra.mxu0 %v5267_v52 }
 0x4a9   :  { %3793 = vmatprep.subr.bf16.mxu0 %v5272_v53 }
 0x4ac   :  { %3794 = vmatpush1.bf16.msra.mxu0 %v5270_v54 }
 0x4ad   :  { %3795 = vmatprep.subr.bf16.mxu0 %v5275_v55 }
 0x4b0   :  { %3796 = vmatpush1.bf16.msra.mxu0 %v5273_v56 }
 0x4b1   :  { %3797 = vmatprep.subr.bf16.mxu0 %v5278_v57 }
 0x4b4   :  { %3798 = vmatpush1.bf16.msra.mxu0 %v5276_v59 }
 0x4b5   :  { %3799 = vmatprep.subr.bf16.mxu0 %v5281_v60 }
 0x4b8   :  { %3800 = vmatpush1.bf16.msra.mxu0 %v5279_v61 }
 0x4b9   :  { %3801 = vmatprep.subr.bf16.mxu0 %v5284_v62 }
 0x4bc   :  { %3802 = vmatpush1.bf16.msra.mxu0 %v5282_v0 }
 0x4bd   :  { %3803 = vmatprep.subr.bf16.mxu0 %v5287_v1 }
 0x4c0   :  { %3804 = vmatpush1.bf16.msra.mxu0 %v5285_v2 }
 0x4c1   :  { %3805 = vmatprep.subr.bf16.mxu0 %v5290_v4 }
 0x4c4   :  { %3806 = vmatpush1.bf16.msra.mxu0 %v5288_v5 }
 0x4c7   :  { %3808 = vmatmul.mubr.bf16.vlgmr.msra.gmra.mrb[12].mxu0 %v6611_v28 }
 0x51a   :  { %v3645_v12 = vpop.f32.mrb[8].mxu0  ;;  %v3727_v13 = vpop.f32.mrb[16].mxu1 }
 0x51b   :  { %v4582_v28 = vadd.f32 %v3645_v12, %v2386_v7  ;;  %v4584_v11 = vadd.f32 %v3727_v13, %v2394_v8  ;;  %v3647_v16 = vpop.f32.mrb[9].mxu0  ;;  %v3729_v18 = vpop.f32.mrb[17].mxu1 }
 0x51c   :  { %v4583_v15 = vadd.f32 %v3647_v16, %v2390_v9  ;;  %v4585_v58 = vadd.f32 %v3729_v18, %v2398_v10  ;;  %v3649_v20 = vpop.f32.mrb[10].mxu0  ;;  %v3731_v21 = vpop.f32.mrb[18].mxu1 }
 0x51d   :  { %v4475_v34 = vmul.f32 -1.442695, %v4582_v28  ;;  %v4477_v22 = vmul.f32 -1.442695, %v4584_v11  ;;  %v3650_v23 = vpop.f32.mrb[11].mxu0  ;;  %v3732_v3 = vpop.f32.mrb[19].mxu1 }
 0x51e   :  { %v4476_v63 = vmul.f32 -1.442695, %v4583_v15  ;;  %v4478_v24 = vmul.f32 -1.442695, %v4585_v58 }
 0x51f   :  { %5293 = vpow2.f32 %v4475_v34 }
 0x520   :  { %5295 = vpow2.f32 %v4477_v22 }
 0x521   :  { %5297 = vpow2.f32 %v4476_v63 }
 0x522   :  { %5299 = vpow2.f32 %v4478_v24 }
 0x529   :  { %v5294_v36 = vpop.eup %5293 }
 0x52a   :  { %v5296_v37 = vpop.eup %5295  ;;  %v3917_v25 = vadd.f32 1.0, %v5294_v36 }
 0x52b   :  { %v5298_v26 = vpop.eup %5297  ;;  %v3919_v27 = vadd.f32 1.0, %v5296_v37 }
 0x52c   :  { %v5300_v29 = vpop.eup %5299  ;;  %5301 = vrcp.f32 %v3917_v25  ;;  %v3918_v30 = vadd.f32 1.0, %v5298_v26 }
 0x52d   :  { %5303 = vrcp.f32 %v3919_v27  ;;  %v3920_v31 = vadd.f32 1.0, %v5300_v29 }
 0x52e   :  { %5305 = vrcp.f32 %v3918_v30 }
 0x52f   :  { %5307 = vrcp.f32 %v3920_v31 }
 0x536   :  { %v5302_v32 = vpop.eup %5301 }
 0x537   :  { %v5304_v35 = vpop.eup %5303 }
 0x538   :  { %v5306_v38 = vpop.eup %5305 }
 0x539   :  { %v5308_v39 = vpop.eup %5307  ;;  %v4486_v40 = vpack.c.bf16 %v5306_v38, %v5302_v32 }
 0x53a   :  { %v4487_v14 = vpack.c.bf16 %v5308_v39, %v5304_v35 }
 0x53b   :  { %v4550_v41 = vpop.f32.mrb[20].mxu1  ;;  %3967 = vst [vmem:[#allocation2] sm:$0xff] %v4486_v40 }
 0x53c   :  { %v4551_v42 = vpop.f32.mrb[21].mxu1  ;;  %3968 = vst [vmem:[#allocation2 + $0x8] sm:$0xff] %v4487_v14 }
 0x53d   :  { %v4552_v17 = vadd.f32 %v4551_v42, %v4550_v41  ;;  %v4553_v19 = vpop.f32.mrb[22].mxu1 }
 0x53e   :  { %5332 = shalt.err (!%p5329_p4)
}
 0x53f   :  { %s5333_s6 = scalar_lea.hbm %s6956_s11, 128 }
 0x540   :  { %p5334_p5 = scmp.ne.s32.totalorder %s6956_s11, %s5333_s6  ;;  %p5337_p6 = scmp.lt.u32.totalorder %s5333_s6, %s6956_s11 }
 0x542   :  { %p5339_p7 = pnand %p5337_p6, %p5334_p5 }
 0x544   :  { %5342 = shalt.err (!%p5339_p7)
}
 0x545   :  { %3992 = dma.vmem_to_hbm [thread:$0]  %s3990_s9, 128, %s6956_s11, [#allocation5]   ;;  %v4554_v43 = vpop.f32.mrb[23].mxu1  ;;  %v2409_v44 = vsub.s32 6, %v6099_v33  ;;  %vm3970_vm3 = vcmask 125952   ;;  %v2401_v59 = vsub.s32 4, %v6099_v33 }
 0x546   :  { %v2405_v60 = vsub.s32 5, %v6099_v33  ;;  %s5372_s11 = smov [#allocation2]  }
 0x547   :  { %v2410_v45 = vrot.slane %v6905_v6, %v2409_v44  ;;  %v2402_v61 = vrot.slane %v6905_v6, %v2401_v59  ;;  %s3979_s2 = sshll.u32 %s5372_s11, 4  ;;  %s3980_s2 = int_to_ptr.vmem [resolvable:$true] %s3979_s2 }
 0x548   :  { %v2406_v62 = vrot.slane %v6905_v6, %v2405_v60  ;;  %s5343_s18 = scalar_lea.vmem %s3980_s2, 448  ;;  %p5348_p9 = scmp.lt.s32.totalorder %s3980_s2, %s3980_s2 }
 0x549   :  { %v3851_v48 = vadd.f32 %v4552_v17, %v2410_v45  ;;  %p5344_p8 = scmp.ne.s32.totalorder %s3980_s2, %s5343_s18  ;;  %p5349_p10 = scmp.lt.s32.totalorder %s5343_s18, %s5343_s18 }
 0x54b   :  { %p5350_p11 = por %p5349_p10, %p5348_p9 }
 0x54d   :  { %p5351_p12 = pnand %p5350_p11, %p5344_p8 }
 0x55b   :  { %v4572_v46 = vpop.f32.mrb[24].mxu1 }
 0x55c   :  { %v4573_v47 = vpop.f32.mrb[25].mxu1 }
 0x55d   :  { %v4574_v49 = vadd.f32 %v4573_v47, %v4572_v46  ;;  %v4575_v50 = vpop.f32.mrb[26].mxu1 }
 0x55e   :  { %v4576_v51 = vpop.f32.mrb[27].mxu1 }
 0x55f   :  { %v3891_v52 = vadd.f32 %v4574_v49, %v3851_v48 }
 0x561   :  { %v4481_v53 = vmul.f32 -1.442695, %v3891_v52 }
 0x563   :  { %5309 = vpow2.f32 %v4481_v53 }
 0x56d   :  { %v5310_v54 = vpop.eup %5309 }
 0x56e   :  { %v3923_v55 = vadd.f32 1.0, %v5310_v54 }
 0x570   :  { %5311 = vrcp.f32 %v3923_v55 }
 0x57a   :  { %v5312_v56 = vpop.eup %5311 }
 0x57b   :  { %v4489_v57 = vpack.c.bf16 %v5312_v56, %v5312_v56 }
 0x57d   :  { %3971 = vst.msk [vmem:[#allocation2 + $0x18] sm:$0xf] %vm3970_vm3, %v4489_v57 }
 0x59a   :  { %v3809_v0 = vpop.f32.mrb[12].mxu0 }
 0x59b   :  { %v4586_v1 = vadd.f32 %v3809_v0, %v2402_v61  ;;  %v3811_v2 = vpop.f32.mrb[13].mxu0 }
 0x59c   :  { %v4587_v4 = vadd.f32 %v3811_v2, %v2406_v62  ;;  %v3813_v5 = vpop.f32.mrb[14].mxu0 }
 0x59d   :  { %v4479_v7 = vmul.f32 -1.442695, %v4586_v1  ;;  %v3814_v8 = vpop.f32.mrb[15].mxu0 }
 0x59e   :  { %v4480_v9 = vmul.f32 -1.442695, %v4587_v4 }
 0x59f   :  { %5313 = vpow2.f32 %v4479_v7 }
 0x5a0   :  { %5315 = vpow2.f32 %v4480_v9 }
 0x5a9   :  { %v5314_v10 = vpop.eup %5313 }
 0x5aa   :  { %v5316_v12 = vpop.eup %5315  ;;  %v3921_v13 = vadd.f32 1.0, %v5314_v10 }
 0x5ab   :  { %v3922_v28 = vadd.f32 1.0, %v5316_v12 }
 0x5ac   :  { %5317 = vrcp.f32 %v3921_v13 }
 0x5ad   :  { %5319 = vrcp.f32 %v3922_v28 }
 0x5b6   :  { %v5318_v33 = vpop.eup %5317 }
 0x5b7   :  { %v5320_v6 = vpop.eup %5319 }
 0x5b8   :  { %v4488_v11 = vpack.c.bf16 %v5320_v6, %v5318_v33 }
 0x5ba   :  { %3969 = vst [vmem:[#allocation2 + $0x10] sm:$0xff] %v4488_v11 }
 0x5bb   :  { %5354 = shalt.err (!%p5351_p12)
}
 0x5bc   :  { %s5355_s21 = scalar_lea.hbm %s6955_s10, 448 }
 0x5bd   :  { %p5356_p13 = scmp.ne.s32.totalorder %s6955_s10, %s5355_s21  ;;  %p5359_p0 = scmp.lt.u32.totalorder %s5355_s21, %s6955_s10 }
 0x5bf   :  { %p5361_p1 = pnand %p5359_p0, %p5356_p13 }
 0x5c1   :  { %5364 = shalt.err (!%p5361_p1)
}
 0x5c2   :  { %3982 = dma.vmem_to_hbm [thread:$0]  %s3980_s2, 448, %s6955_s10, [#allocation3]  }
 0x5c3   :  { %5365 = dma.done.wait [#allocation3], 448  }
 0x5c4   :  { %5366 = vsyncadd [#allocation3], 4294966848 }
 0x5c5   :  { %5367 = dma.done.wait [#allocation5], 128  }
 0x5c6   :  { %5368 = vsyncadd [#allocation5], 4294967168 }
 0x5c7   :  { %3999 = vsyncpa [#allocation3], 1 }
 0x5c8   :  { %4000 = vsyncpa [#allocation5], 1 }

</bundles_post_ra>
